<compile_context>
chip_gen: v6e
topology: v6e:2x2x1
jax: 0.10.0
libtpu: 0.0.40
codegen_flags: <defaults>
</compile_context>

<pallas_src>
import functools
import math

import jax
import jax.numpy as jnp
import numpy as np
from jax.experimental import pallas as pl
from jax.experimental.pallas import tpu as pltpu

_LANE = 128
_ROW_ALIGN = 512  # node-dim padding granularity -> tm/tk can always be 512


def _round_up(x, m):
    return (x + m - 1) // m * m


def _pad2(a, rows, cols, dtype):
    a = a.astype(dtype)
    r, c = a.shape
    return jnp.pad(a, ((0, rows - r), (0, cols - c)))


def _vmem_budget_bytes():
    """75% of this generation's physical VMEM (v5e/v6e: 128 MiB, v7x: 64 MiB)."""
    cap = 64 * 1024 * 1024
    try:
        info = pltpu.get_tpu_info()
        cap = int(getattr(info, "vmem_capacity_bytes", cap) or cap)
    except Exception:
        pass
    return (cap * 3) // 4


# --------------------------------------------------------------------------
# Kernel 1: ML = relu(A @ (X @ Wg + bg)) @ [Wm|Wl] + [bm|bl]
#           (row-tiled, k-reduction; stage-1 linear fused into the k loop)
# --------------------------------------------------------------------------
def _gcn_ml_kernel(a_ref, x_ref, wg_ref, bg_ref, wml_ref, bml_ref,
                   ml_ref, acc_ref, *, x_resident, tk):
    k = pl.program_id(1)

    @pl.when(k == 0)
    def _():
        acc_ref[...] = jnp.zeros_like(acc_ref)

    if x_resident:
        x_blk = x_ref[pl.ds(pl.multiple_of(k * tk, tk), tk), :]
    else:
        x_blk = x_ref[...]

    # H0_k = X_k @ Wg + bg (recomputed per row tile; exact)
    h0 = (jnp.dot(x_blk, wg_ref[...], preferred_element_type=jnp.float32)
          + bg_ref[...]).astype(a_ref.dtype)
    acc_ref[...] += jnp.dot(a_ref[...], h0, preferred_element_type=jnp.float32)

    @pl.when(k == pl.num_programs(1) - 1)
    def _():
        l1 = jnp.maximum(acc_ref[...], 0.0).astype(wml_ref.dtype)
        ml = jnp.dot(l1, wml_ref[...], preferred_element_type=jnp.float32)
        ml_ref[...] = (ml + bml_ref[...]).astype(ml_ref.dtype)


# --------------------------------------------------------------------------
# Kernel 2: [mean|logstd] = A @ ML ; z = noise*exp(logstd)+mean ;
#           h1 = relu(z @ [WA1|WX1] + b1) ; dec_X = relu(h1_X @ WX2 + bX2)
# --------------------------------------------------------------------------
def _reparam_decx_kernel(a_ref, ml_ref, noise_ref, w1_ref, b1_ref,
                         wx2_ref, bx2_ref,
                         z_ref, h1a_ref, dx_ref, acc_ref, *, ml_resident, tk):
    k = pl.program_id(1)

    @pl.when(k == 0)
    def _():
        acc_ref[...] = jnp.zeros_like(acc_ref)

    if ml_resident:
        ml_blk = ml_ref[pl.ds(pl.multiple_of(k * tk, tk), tk), :]
    else:
        ml_blk = ml_ref[...]

    acc_ref[...] += jnp.dot(a_ref[...], ml_blk, preferred_element_type=jnp.float32)

    @pl.when(k == pl.num_programs(1) - 1)
    def _():
        out_pad = noise_ref.shape[1]
        half_pad = wx2_ref.shape[0]
        acc = acc_ref[...]
        mean = acc[:, :out_pad]
        logstd = acc[:, out_pad:]

        # reparameterize (f32 element-wise epilogue; v5e-safe)
        z = noise_ref[...].astype(jnp.float32) * jnp.exp(logstd) + mean
        z_ref[...] = z.astype(z_ref.dtype)

        # fused first decoder layers: [dec_A hidden | dec_X hidden]
        h1 = jnp.dot(z.astype(w1_ref.dtype), w1_ref[...],
                     preferred_element_type=jnp.float32) + b1_ref[...]
        h1 = jnp.maximum(h1, 0.0)
        h1a_ref[...] = h1[:, :half_pad].astype(h1a_ref.dtype)

        dx = jnp.dot(h1[:, half_pad:].astype(wx2_ref.dtype), wx2_ref[...],
                     preferred_element_type=jnp.float32) + bx2_ref[...]
        dx_ref[...] = jnp.maximum(dx, 0.0).astype(dx_ref.dtype)


# --------------------------------------------------------------------------
# Kernel 3: dec_A = sigmoid(h1_A @ WA2 + bA2)   (row AND column tiled)
# --------------------------------------------------------------------------
def _deca_kernel(h1a_ref, wa2_ref, ba2_ref, da_ref):
    da = jnp.dot(h1a_ref[...], wa2_ref[...],
                 preferred_element_type=jnp.float32) + ba2_ref[...]
    # approx sigmoid (~1e-3 rel err): reciprocal goes to the EUP slot.
    da_ref[...] = pl.reciprocal(1.0 + jnp.exp(-da), approx=True).astype(da_ref.dtype)


# --------------------------------------------------------------------------
# Wrapper
# --------------------------------------------------------------------------
def vgae_forward(x, a_matrix, noise, params, *,
                 compute_dtype=jnp.bfloat16, out_dtype=jnp.bfloat16):
    """Returns (dec_A, dec_X, z) matching PyTorch VGAE.forward (bf16 outputs)."""
    n, dim_in = x.shape
    out = noise.shape[1]
    middle = params["Wg"].shape[0]
    half = params["WA1"].shape[0]

    n_pad = _round_up(n, _ROW_ALIGN)
    di_pad = _round_up(dim_in, _LANE)
    mid_pad = _round_up(middle, _LANE)
    out_pad = _round_up(out, _LANE)
    half_pad = _round_up(half, _LANE)

    vmem_limit = _vmem_budget_bytes()

    # row / contraction / dec_A-column tiles (multiples of 512 dividing n_pad)
    tm = 1024 if (vmem_limit >= 80 * 1024 * 1024 and n_pad % 1024 == 0) else 512
    tk = 512
    tn_col = 512
    grid_rows = n_pad // tm
    grid_k = n_pad // tk
    grid_cols = n_pad // tn_col

    cdt = compute_dtype
    f32 = jnp.float32
    itemsize = jnp.dtype(cdt).itemsize

    # padded activations / adjacency / noise
    # TODO(synk): on v5e/v6e an int8-quantized A (scale folded into the epilogue)
    # would halve the dominant HBM read; on v7x that would need fp8 (no int MXU).
    x_p = _pad2(x, n_pad, di_pad, cdt)
    a_p = _pad2(a_matrix, n_pad, n_pad, cdt)
    noise_p = _pad2(noise, n_pad, out_pad, f32)

    # pre-transposed ([in, out]) + zero-padded + fused weights
    wg = _pad2(params["Wg"].T, di_pad, mid_pad, cdt)
    bg = _pad2(params["bg"], 1, mid_pad, f32)
    w_ml = jnp.concatenate([_pad2(params["Wm"].T, mid_pad, out_pad, cdt),
                            _pad2(params["Wl"].T, mid_pad, out_pad, cdt)], axis=1)
    b_ml = jnp.concatenate([_pad2(params["bm"], 1, out_pad, f32),
                            _pad2(params["bl"], 1, out_pad, f32)], axis=1)
    w1 = jnp.concatenate([_pad2(params["WA1"].T, out_pad, half_pad, cdt),
                          _pad2(params["WX1"].T, out_pad, half_pad, cdt)], axis=1)
    b1 = jnp.concatenate([_pad2(params["bA1"], 1, half_pad, f32),
                          _pad2(params["bX1"], 1, half_pad, f32)], axis=1)
    wa2 = _pad2(params["WA2"].T, half_pad, n_pad, cdt)
    ba2 = _pad2(params["bA2"], 1, n_pad, f32)
    wx2 = _pad2(params["WX2"].T, half_pad, di_pad, cdt)
    bx2 = _pad2(params["bX2"], 1, di_pad, f32)

    # Keep X / ML fully VMEM-resident (fetched once) when they fit comfortably
    # (always true on v5e/v6e for moderate N); else stream (tk, .) slabs per k.
    x_resident = (n_pad * di_pad * itemsize) <= vmem_limit // 8
    ml_resident = (n_pad * 2 * out_pad * itemsize) <= vmem_limit // 8

    # NOTE: after dec_A column tiling the constant-index weight/bias blocks are
    # at most a few hundred KiB, so their default double-buffering is negligible.
    # TODO(synk): pipeline_mode=pl.Buffered(1) on constant weight blocks once
    # confirmed supported by the target jax/libtpu.
    # TODO(synk): on v7x, if a profile shows one TensorCore idle, switch the row
    # axis to pltpu.CORE_PARALLEL (plain "parallel" suffices on v5e/v6e).
    sem2 = ("parallel", "arbitrary")

    # ---- stage 1+2 fused: ML = relu(A @ (X@Wg + bg)) @ [Wm|Wl] + [bm|bl] ----
    if x_resident:
        x_spec = pl.BlockSpec((n_pad, di_pad), lambda i, k: (0, 0))
        x_bytes = n_pad * di_pad * itemsize
    else:
        x_spec = pl.BlockSpec((tk, di_pad), lambda i, k: (k, 0))
        x_bytes = grid_rows * n_pad * di_pad * itemsize

    ml = pl.pallas_call(
        functools.partial(_gcn_ml_kernel, x_resident=x_resident, tk=tk),
        out_shape=jax.ShapeDtypeStruct((n_pad, 2 * out_pad), cdt),
        grid=(grid_rows, grid_k),
        in_specs=[pl.BlockSpec((tm, tk), lambda i, k: (i, k)),
                  x_spec,
                  pl.BlockSpec((di_pad, mid_pad), lambda i, k: (0, 0)),
                  pl.BlockSpec((1, mid_pad), lambda i, k: (0, 0)),
                  pl.BlockSpec((mid_pad, 2 * out_pad), lambda i, k: (0, 0)),
                  pl.BlockSpec((1, 2 * out_pad), lambda i, k: (0, 0))],
        out_specs=pl.BlockSpec((tm, 2 * out_pad), lambda i, k: (i, 0)),
        scratch_shapes=[pltpu.VMEM((tm, mid_pad), jnp.float32)],
        compiler_params=pltpu.CompilerParams(
            dimension_semantics=sem2, vmem_limit_bytes=vmem_limit),
        cost_estimate=pl.CostEstimate(
            flops=(2 * grid_rows * n_pad * di_pad * mid_pad
                   + 2 * n_pad * n_pad * mid_pad
                   + 4 * n_pad * mid_pad * out_pad),
            transcendentals=0,
            bytes_accessed=(n_pad * n_pad * itemsize + x_bytes
                            + (di_pad * mid_pad + 2 * mid_pad * out_pad) * itemsize
                            + n_pad * 2 * out_pad * itemsize)),
    )(a_p, x_p, wg, bg, w_ml, b_ml)

    # ---- stage 3a: A-agg of [mean|logstd], reparam, dec_X, dec_A hidden ----
    if ml_resident:
        ml_spec = pl.BlockSpec((n_pad, 2 * out_pad), lambda i, k: (0, 0))
        ml_bytes = n_pad * 2 * out_pad * itemsize
    else:
        ml_spec = pl.BlockSpec((tk, 2 * out_pad), lambda i, k: (k, 0))
        ml_bytes = grid_rows * n_pad * 2 * out_pad * itemsize

    z_p, h1a_p, dec_x_p = pl.pallas_call(
        functools.partial(_reparam_decx_kernel, ml_resident=ml_resident, tk=tk),
        out_shape=(jax.ShapeDtypeStruct((n_pad, out_pad), out_dtype),
                   jax.ShapeDtypeStruct((n_pad, half_pad), cdt),
                   jax.ShapeDtypeStruct((n_pad, di_pad), out_dtype)),
        grid=(grid_rows, grid_k),
        in_specs=[pl.BlockSpec((tm, tk), lambda i, k: (i, k)),
                  ml_spec,
                  pl.BlockSpec((tm, out_pad), lambda i, k: (i, 0)),
                  pl.BlockSpec((out_pad, 2 * half_pad), lambda i, k: (0, 0)),
                  pl.BlockSpec((1, 2 * half_pad), lambda i, k: (0, 0)),
                  pl.BlockSpec((half_pad, di_pad), lambda i, k: (0, 0)),
                  pl.BlockSpec((1, di_pad), lambda i, k: (0, 0))],
        out_specs=(pl.BlockSpec((tm, out_pad), lambda i, k: (i, 0)),
                   pl.BlockSpec((tm, half_pad), lambda i, k: (i, 0)),
                   pl.BlockSpec((tm, di_pad), lambda i, k: (i, 0))),
        scratch_shapes=[pltpu.VMEM((tm, 2 * out_pad), jnp.float32)],
        compiler_params=pltpu.CompilerParams(
            dimension_semantics=sem2, vmem_limit_bytes=vmem_limit),
        cost_estimate=pl.CostEstimate(
            flops=(4 * n_pad * n_pad * out_pad
                   + 4 * n_pad * out_pad * half_pad
                   + 2 * n_pad * half_pad * di_pad),
            transcendentals=n_pad * out_pad,
            bytes_accessed=(n_pad * n_pad * itemsize + ml_bytes
                            + n_pad * out_pad * 4
                            + (2 * out_pad * half_pad + half_pad * di_pad) * itemsize
                            + n_pad * (out_pad + half_pad + di_pad) * itemsize)),
    )(a_p, ml, noise_p, w1, b1, wx2, bx2)

    # ---- stage 3b: dec_A = sigmoid(h1_A @ WA2 + bA2), row & column tiled ----
    dec_a_p = pl.pallas_call(
        _deca_kernel,
        out_shape=jax.ShapeDtypeStruct((n_pad, n_pad), out_dtype),
        grid=(grid_rows, grid_cols),
        in_specs=[pl.BlockSpec((tm, half_pad), lambda i, j: (i, 0)),
                  pl.BlockSpec((half_pad, tn_col), lambda i, j: (0, j)),
                  pl.BlockSpec((1, tn_col), lambda i, j: (0, j))],
        out_specs=pl.BlockSpec((tm, tn_col), lambda i, j: (i, j)),
        compiler_params=pltpu.CompilerParams(
            dimension_semantics=("parallel", "parallel"),
            vmem_limit_bytes=vmem_limit),
        cost_estimate=pl.CostEstimate(
            flops=2 * n_pad * half_pad * n_pad,
            transcendentals=n_pad * n_pad,
            bytes_accessed=(n_pad * half_pad * itemsize
                            + grid_rows * half_pad * n_pad * itemsize
                            + n_pad * n_pad * jnp.dtype(out_dtype).itemsize)),
    )(h1a_p, wa2, ba2)

    return (dec_a_p[:n, :n], dec_x_p[:n, :dim_in], z_p[:n, :out])


# --------------------------------------------------------------------------
# Parameter init (PyTorch nn.Linear shapes/convention) and pure-JAX reference
# --------------------------------------------------------------------------
def init_params(key, n, dim_in, middle_out, output):
    def linear(k, fan_out, fan_in):
        k1, k2 = jax.random.split(k)
        bound = 1.0 / math.sqrt(fan_in)
        w = jax.random.uniform(k1, (fan_out, fan_in), jnp.float32, -bound, bound)
        b = jax.random.uniform(k2, (1, fan_out), jnp.float32, -bound, bound)
        return w, b

    keys = jax.random.split(key, 7)
    Wg, bg = linear(keys[0], middle_out, dim_in)      # gcn.fgcn
    Wm, bm = linear(keys[1], output, middle_out)      # f_mean.fgcn
    Wl, bl = linear(keys[2], output, middle_out)      # f_logstddev.fgcn
    WA1, bA1 = linear(keys[3], output // 2, output)   # delayerA1
    WA2, bA2 = linear(keys[4], n, output // 2)        # delayerA2
    WX1, bX1 = linear(keys[5], output // 2, output)   # delayerX1
    WX2, bX2 = linear(keys[6], dim_in, output // 2)   # delayerX2
    return dict(Wg=Wg, bg=bg, Wm=Wm, bm=bm, Wl=Wl, bl=bl,
                WA1=WA1, bA1=bA1, WA2=WA2, bA2=bA2,
                WX1=WX1, bX1=bX1, WX2=WX2, bX2=bX2)


def vgae_reference(x, A, noise, params, compute_dtype=jnp.bfloat16):
    """Pure-JAX reference mimicking the kernel's bf16-operand / f32-accumulate math."""
    def q(t):
        return t.astype(compute_dtype).astype(jnp.float32)

    xq, Aq = q(x), q(A)
    h0 = xq @ q(params["Wg"].T) + params["bg"]
    l1 = jnp.maximum(Aq @ q(h0), 0.0)
    mean = Aq @ q(q(l1) @ q(params["Wm"].T) + params["bm"])
    logstd = Aq @ q(q(l1) @ q(params["Wl"].T) + params["bl"])
    z = noise * jnp.exp(logstd) + mean
    da = jnp.maximum(q(z) @ q(params["WA1"].T) + params["bA1"], 0.0)
    da = jax.nn.sigmoid(q(da) @ q(params["WA2"].T) + params["bA2"])
    dx = jnp.maximum(q(z) @ q(params["WX1"].T) + params["bX1"], 0.0)
    dx = jnp.maximum(q(dx) @ q(params["WX2"].T) + params["bX2"], 0.0)
    return da, dx, z


if __name__ == "__main__":
    # N graph nodes, dim_in input feats, middle_out hidden, output latent dim.
    N, DIM_IN, MIDDLE_OUT, OUTPUT = 8, 16, 32, 16

    key = jax.random.PRNGKey(0)
    k_x, k_a, k_noise, k_params = jax.random.split(key, 4)

    x = jax.random.normal(k_x, (N, DIM_IN), jnp.float32)
    a_raw = jax.random.uniform(k_a, (N, N), jnp.float32)
    a_matrix = (a_raw + a_raw.T) / (2.0 * N) + jnp.eye(N, dtype=jnp.float32)
    noise = jax.random.normal(k_noise, (N, OUTPUT), jnp.float32)

    params = init_params(k_params, N, DIM_IN, MIDDLE_OUT, OUTPUT)

    dec_a, dec_x, z = vgae_forward(x, a_matrix, noise, params)
    jax.block_until_ready((dec_a, dec_x, z))

    assert dec_a.shape == (N, N)
    assert dec_x.shape == (N, DIM_IN)
    assert z.shape == (N, OUTPUT)

    ref_a, ref_x, ref_z = vgae_reference(x, a_matrix, noise, params)
    np.testing.assert_allclose(np.asarray(dec_a.astype(jnp.float32)),
                               np.asarray(ref_a), rtol=5e-2, atol=5e-2)
    np.testing.assert_allclose(np.asarray(dec_x.astype(jnp.float32)),
                               np.asarray(ref_x), rtol=5e-2, atol=5e-2)
    np.testing.assert_allclose(np.asarray(z.astype(jnp.float32)),
                               np.asarray(ref_z), rtol=5e-2, atol=5e-2)

    print("KERNEL_OK")
</pallas_src>

<mosaic_0001>
module attributes {stable_mosaic.version = 11 : i64} {
  func.func @_gcn_ml_kernel(%arg0: i32, %arg1: i32, %arg2: memref<512x512xbf16, #tpu.memory_space<vmem>>, %arg3: memref<512x128xbf16, #tpu.memory_space<vmem>>, %arg4: memref<128x128xbf16, #tpu.memory_space<vmem>>, %arg5: memref<1x128xf32, #tpu.memory_space<vmem>>, %arg6: memref<128x256xbf16, #tpu.memory_space<vmem>>, %arg7: memref<1x256xf32, #tpu.memory_space<vmem>>, %arg8: memref<512x256xbf16, #tpu.memory_space<vmem>>, %arg9: memref<512x128xf32, #tpu.memory_space<vmem>>) attributes {dimension_semantics = [#tpu.dimension_semantics<parallel>, #tpu.dimension_semantics<arbitrary>], iteration_bounds = array<i64: 1, 1>, scalar_prefetch = 0 : i64, scratch_operands = 1 : i64, tpu.core_type = #tpu.core_type<tc>, window_params = [{transform_indices = @transform_0, window_bounds = array<i64: 512, 512>}, {pipeline_mode = #tpu.pipeline_mode<synchronous>, transform_indices = @transform_1, window_bounds = array<i64: 512, 128>}, {pipeline_mode = #tpu.pipeline_mode<synchronous>, transform_indices = @transform_2, window_bounds = array<i64: 128, 128>}, {pipeline_mode = #tpu.pipeline_mode<synchronous>, transform_indices = @transform_3, window_bounds = array<i64: 1, 128>}, {pipeline_mode = #tpu.pipeline_mode<synchronous>, transform_indices = @transform_4, window_bounds = array<i64: 128, 256>}, {pipeline_mode = #tpu.pipeline_mode<synchronous>, transform_indices = @transform_5, window_bounds = array<i64: 1, 256>}, {transform_indices = @transform_6, window_bounds = array<i64: 512, 256>}]} {
    %c0_i32 = arith.constant 0 : i32
    %0 = arith.cmpi eq, %arg1, %c0_i32 : i32
    %1 = arith.extui %0 : i1 to i32
    %c0_i32_0 = arith.constant 0 : i32
    %2 = arith.cmpi ne, %1, %c0_i32_0 : i32
    scf.if %2 {
      %cst_14 = arith.constant 0.000000e+00 : f32
      %21 = vector.broadcast %cst_14 : f32 to vector<512x128xf32>
      %c0_15 = arith.constant 0 : index
      %c0_16 = arith.constant 0 : index
      %22 = vector.load %arg9[%c0_15, %c0_16] : memref<512x128xf32, #tpu.memory_space<vmem>>, vector<512x128xf32>
      tpu.vector_store %arg9[%c0_15, %c0_16], %21 {strides = array<i32>} : memref<512x128xf32, #tpu.memory_space<vmem>>, vector<512x128xf32>,
    } else {
    }
    %c512_i32 = arith.constant 512 : i32
    %3 = arith.muli %arg1, %c512_i32 : i32
    %4 = tpu.assume_multiple %3, 512 : i32
    %5 = arith.index_cast %4 : i32 to index
    %c0 = arith.constant 0 : index
    %6 = vector.load %arg3[%5, %c0] : memref<512x128xbf16, #tpu.memory_space<vmem>>, vector<512x128xbf16>
    %c0_1 = arith.constant 0 : index
    %c0_2 = arith.constant 0 : index
    %7 = vector.load %arg4[%c0_1, %c0_2] : memref<128x128xbf16, #tpu.memory_space<vmem>>, vector<128x128xbf16>
    %cst = arith.constant dense<0.000000e+00> : vector<512x128xf32>
    %8 = tpu.matmul %6, %7, %cst {dimension_numbers = #tpu.dot_dimension_numbers<[1], [0], [0], [1], [0, 0, 1, 1], [], []>} : vector<512x128xbf16>, vector<128x128xbf16>, vector<512x128xf32> -> vector<512x128xf32>
    %c0_3 = arith.constant 0 : index
    %c0_4 = arith.constant 0 : index
    %9 = vector.load %arg5[%c0_3, %c0_4] : memref<1x128xf32, #tpu.memory_space<vmem>>, vector<1x128xf32>
    %10 = vector.broadcast %9 : vector<1x128xf32> to vector<512x128xf32>
    %11 = arith.addf %8, %10 : vector<512x128xf32>
    %12 = arith.truncf %11 : vector<512x128xf32> to vector<512x128xbf16>
    %c0_5 = arith.constant 0 : index
    %c0_6 = arith.constant 0 : index
    %13 = vector.load %arg9[%c0_5, %c0_6] : memref<512x128xf32, #tpu.memory_space<vmem>>, vector<512x128xf32>
    %c0_7 = arith.constant 0 : index
    %c0_8 = arith.constant 0 : index
    %14 = vector.load %arg2[%c0_7, %c0_8] : memref<512x512xbf16, #tpu.memory_space<vmem>>, vector<512x512xbf16>
    %cst_9 = arith.constant dense<0.000000e+00> : vector<512x128xf32>
    %15 = tpu.matmul %14, %12, %cst_9 {dimension_numbers = #tpu.dot_dimension_numbers<[1], [0], [0], [1], [0, 0, 1, 1], [], []>} : vector<512x512xbf16>, vector<512x128xbf16>, vector<512x128xf32> -> vector<512x128xf32>
    %16 = arith.addf %13, %15 : vector<512x128xf32>
    %c0_10 = arith.constant 0 : index
    %c0_11 = arith.constant 0 : index
    %17 = vector.load %arg9[%c0_10, %c0_11] : memref<512x128xf32, #tpu.memory_space<vmem>>, vector<512x128xf32>
    tpu.vector_store %arg9[%c0_10, %c0_11], %16 {strides = array<i32>} : memref<512x128xf32, #tpu.memory_space<vmem>>, vector<512x128xf32>,
    %c0_i32_12 = arith.constant 0 : i32
    %18 = arith.cmpi eq, %arg1, %c0_i32_12 : i32
    %19 = arith.extui %18 : i1 to i32
    %c0_i32_13 = arith.constant 0 : i32
    %20 = arith.cmpi ne, %19, %c0_i32_13 : i32
    scf.if %20 {
      %c0_14 = arith.constant 0 : index
      %c0_15 = arith.constant 0 : index
      %21 = vector.load %arg9[%c0_14, %c0_15] : memref<512x128xf32, #tpu.memory_space<vmem>>, vector<512x128xf32>
      %cst_16 = arith.constant 0.000000e+00 : f32
      %22 = vector.broadcast %cst_16 : f32 to vector<512x128xf32>
      %23 = arith.maximumf %21, %22 : vector<512x128xf32>
      %24 = arith.truncf %23 : vector<512x128xf32> to vector<512x128xbf16>
      %c0_17 = arith.constant 0 : index
      %c0_18 = arith.constant 0 : index
      %25 = vector.load %arg6[%c0_17, %c0_18] : memref<128x256xbf16, #tpu.memory_space<vmem>>, vector<128x256xbf16>
      %cst_19 = arith.constant dense<0.000000e+00> : vector<512x256xf32>
      %26 = tpu.matmul %24, %25, %cst_19 {dimension_numbers = #tpu.dot_dimension_numbers<[1], [0], [0], [1], [0, 0, 1, 1], [], []>} : vector<512x128xbf16>, vector<128x256xbf16>, vector<512x256xf32> -> vector<512x256xf32>
      %c0_20 = arith.constant 0 : index
      %c0_21 = arith.constant 0 : index
      %27 = vector.load %arg7[%c0_20, %c0_21] : memref<1x256xf32, #tpu.memory_space<vmem>>, vector<1x256xf32>
      %28 = vector.broadcast %27 : vector<1x256xf32> to vector<512x256xf32>
      %29 = arith.addf %26, %28 : vector<512x256xf32>
      %30 = arith.truncf %29 : vector<512x256xf32> to vector<512x256xbf16>
      %c0_22 = arith.constant 0 : index
      %c0_23 = arith.constant 0 : index
      %31 = vector.load %arg8[%c0_22, %c0_23] : memref<512x256xbf16, #tpu.memory_space<vmem>>, vector<512x256xbf16>
      tpu.vector_store %arg8[%c0_22, %c0_23], %30 {strides = array<i32>} : memref<512x256xbf16, #tpu.memory_space<vmem>>, vector<512x256xbf16>,
    } else {
    }
    return
  }
  func.func @transform_0(%arg0: i32, %arg1: i32) -> (i32, i32) {
    %c0_i32 = arith.constant 0 : i32
    return %arg0, %arg1 : i32, i32
  }
  func.func @transform_1(%arg0: i32, %arg1: i32) -> (i32, i32) {
    %c0_i32 = arith.constant 0 : i32
    %c0_i32_0 = arith.constant 0 : i32
    %c0_i32_1 = arith.constant 0 : i32
    return %c0_i32, %c0_i32_0 : i32, i32
  }
  func.func @transform_2(%arg0: i32, %arg1: i32) -> (i32, i32) {
    %c0_i32 = arith.constant 0 : i32
    %c0_i32_0 = arith.constant 0 : i32
    %c0_i32_1 = arith.constant 0 : i32
    return %c0_i32, %c0_i32_0 : i32, i32
  }
  func.func @transform_3(%arg0: i32, %arg1: i32) -> (i32, i32) {
    %c0_i32 = arith.constant 0 : i32
    %c0_i32_0 = arith.constant 0 : i32
    %c0_i32_1 = arith.constant 0 : i32
    return %c0_i32, %c0_i32_0 : i32, i32
  }
  func.func @transform_4(%arg0: i32, %arg1: i32) -> (i32, i32) {
    %c0_i32 = arith.constant 0 : i32
    %c0_i32_0 = arith.constant 0 : i32
    %c0_i32_1 = arith.constant 0 : i32
    return %c0_i32, %c0_i32_0 : i32, i32
  }
  func.func @transform_5(%arg0: i32, %arg1: i32) -> (i32, i32) {
    %c0_i32 = arith.constant 0 : i32
    %c0_i32_0 = arith.constant 0 : i32
    %c0_i32_1 = arith.constant 0 : i32
    return %c0_i32, %c0_i32_0 : i32, i32
  }
  func.func @transform_6(%arg0: i32, %arg1: i32) -> (i32, i32) {
    %c0_i32 = arith.constant 0 : i32
    %c0_i32_0 = arith.constant 0 : i32
    return %arg0, %c0_i32 : i32, i32
  }
}

</mosaic_0001>

<bundles_post_ra>
// kernel: tpu_custom_call.1
= control target key start
LH: loop header
LB: loop body
LE: loop exit
PB: predicated region body
PF: predicated region fallthrough
CT: control target
= control target key end

     0   :  { %11 = vsyncpa [#allocation4], 0  ;;  %s4904_s0 = inlined_call_operand.hbm [shape: bf16[512,512], index: 0, kind: input, shape index: {}]   ;;  %s4905_s1 = inlined_call_operand.hbm [shape: bf16[512,128], index: 1, kind: input, shape index: {}]   ;;  %s4906_s2 = inlined_call_operand.hbm [shape: bf16[128,128], index: 2, kind: input, shape index: {}]   ;;  %s4907_s3 = inlined_call_operand.vmem [shape: f32[1,128], index: 3, kind: input, shape index: {}]   ;;  %s4908_s4 = inlined_call_operand.hbm [shape: bf16[128,256], index: 4, kind: input, shape index: {}]   ;;  %s4909_s5 = inlined_call_operand.vmem [shape: f32[1,256], index: 5, kind: input, shape index: {}]   ;;  %s4910_s6 = inlined_call_operand.hbm [shape: bf16[512,256], index: 6, kind: output, shape index: {}]  }
   0x1   :  { %12 = vsyncpa [#allocation7], 0 }
   0x2   :  { %13 = vsyncpa [#allocation10], 0 }
   0x3   :  { %14 = vsyncpa [#allocation5], 0  ;;  %s4273_s21 = smov [#allocation6]  }
   0x4   :  { %s32_s22 = sshll.u32 %s4273_s21, 4  ;;  %s33_s22 = int_to_ptr.vmem [resolvable:$true] %s32_s22 }
   0x5   :  { %s4173_s23 = scalar_lea.vmem %s33_s22, 4096  ;;  %p4178_p1 = scmp.lt.s32.totalorder %s33_s22, %s33_s22 }
   0x6   :  { %p4174_p0 = scmp.ne.s32.totalorder %s33_s22, %s4173_s23  ;;  %p4179_p2 = scmp.lt.s32.totalorder %s4173_s23, %s4173_s23 }
   0x8   :  { %p4180_p3 = por %p4179_p2, %p4178_p1 }
   0xa   :  { %p4181_p4 = pnand %p4180_p3, %p4174_p0 }
   0xc   :  { %4184 = shalt.err (!%p4181_p4)
}
   0xd   :  { %s4274_s24 = smov 64   ;;  %s4275_s25 = smov 4  }
   0xe   :  { %38 = dma.hbm_to_vmem [thread:$0]  %s4905_s1, 4096, %s33_s22, [#allocation7], %s4274_s24, %s4274_s24, %s4275_s25  }
   0xf   :  { %s4276_s28 = smov [#allocation3]  }
  0x10   :  { %s20_s29 = sshll.u32 %s4276_s28, 4  ;;  %s21_s29 = int_to_ptr.vmem [resolvable:$true] %s20_s29 }
  0x11   :  { %s4193_s30 = scalar_lea.vmem %s21_s29, 16384  ;;  %p4198_p6 = scmp.lt.s32.totalorder %s21_s29, %s21_s29 }
  0x12   :  { %p4194_p5 = scmp.ne.s32.totalorder %s21_s29, %s4193_s30  ;;  %p4199_p7 = scmp.lt.s32.totalorder %s4193_s30, %s4193_s30 }
  0x14   :  { %p4200_p8 = por %p4199_p7, %p4198_p6 }
  0x16   :  { %p4201_p9 = pnand %p4200_p8, %p4194_p5 }
  0x18   :  { %4204 = shalt.err (!%p4201_p9)
}
  0x19   :  { %s4277_s7 = smov 256   ;;  %s4278_s8 = smov 16  }
  0x1a   :  { %26 = dma.hbm_to_vmem [thread:$0]  %s4904_s0, 16384, %s21_s29, [#allocation4], %s4277_s7, %s4277_s7, %s4278_s8  }
  0x1b   :  { %s4279_s11 = smov [#allocation8]   ;;  %s4280_s13 = smov [#allocation9]  }
  0x1c   :  { %s44_s12 = sshll.u32 %s4279_s11, 4  ;;  %s58_s1 = sshll.u32 %s4280_s13, 4  ;;  %s45_s12 = int_to_ptr.vmem [resolvable:$true] %s44_s12  ;;  %s59_s1 = int_to_ptr.vmem [resolvable:$true] %s58_s1 }
  0x1d   :  { %s4213_s14 = scalar_lea.vmem %s45_s12, 1024  ;;  %p4218_p11 = scmp.lt.s32.totalorder %s45_s12, %s45_s12 }
  0x1e   :  { %p4214_p10 = scmp.ne.s32.totalorder %s45_s12, %s4213_s14  ;;  %p4219_p12 = scmp.lt.s32.totalorder %s4213_s14, %s4213_s14 }
  0x20   :  { %p4220_p13 = por %p4219_p12, %p4218_p11 }
  0x22   :  { %p4221_p0 = pnand %p4220_p13, %p4214_p10 }
  0x24   :  { %4224 = shalt.err (!%p4221_p0)
}
  0x25   :  { %50 = dma.hbm_to_vmem [thread:$0]  %s4906_s2, 1024, %s45_s12, [#allocation7], %s4274_s24, %s4274_s24, %s4275_s25  }
  0x26   :  { %s4233_s0 = scalar_lea.vmem %s59_s1, 2048  ;;  %p4238_p2 = scmp.lt.s32.totalorder %s59_s1, %s59_s1 }
  0x27   :  { %p4234_p1 = scmp.ne.s32.totalorder %s59_s1, %s4233_s0  ;;  %p4239_p3 = scmp.lt.s32.totalorder %s4233_s0, %s4233_s0 }
  0x29   :  { %p4240_p4 = por %p4239_p3, %p4238_p2 }
  0x2b   :  { %p4241_p5 = pnand %p4240_p4, %p4234_p1 }
  0x2d   :  { %4244 = shalt.err (!%p4241_p5)
}
  0x2e   :  { %s4281_s17 = smov 128   ;;  %s4282_s18 = smov 8  }
  0x2f   :  { %64 = dma.hbm_to_vmem [thread:$0]  %s4908_s4, 2048, %s59_s1, [#allocation10], %s4281_s17, %s4281_s17, %s4282_s18  }
  0x30   :  { %4265 = dma.done.wait [#allocation4], 16384  }
  0x31   :  { %4266 = vsyncadd [#allocation4], 4294950912 }
  0x32   :  { %4267 = dma.done.wait [#allocation7], 5120  }
  0x33   :  { %4268 = vsyncadd [#allocation7], 4294962176 }
  0x34   :  { %4269 = dma.done.wait [#allocation10], 2048  }
  0x35   :  { %4270 = vsyncadd [#allocation10], 4294965248  ;;  %v3909_v0 = vld [vmem:[#allocation8 + $0x38] sm:$0xff]   ;;  %v3910_v1 = vld [vmem:[#allocation8 + $0x30] sm:$0xff]   ;;  %v4283_v35 = vmov 0  }
  0x36   :  { %3785 = vmatprep.subr.bf16.mxu0 %v3909_v0  ;;  %v3911_v2 = vld [vmem:[#allocation8 + $0x28] sm:$0xff]   ;;  %v3912_v3 = vld [vmem:[#allocation8 + $0x20] sm:$0xff]   ;;  %v3913_v5 = vld [vmem:[#allocation8 + $0x18] sm:$0xff]   ;;  %3865 = vmatprep.subr.bf16.mxu1 %v4283_v35 }
  0x37   :  { %3786 = vmatpush3.bf16.msra.mxu0 %v3909_v0  ;;  %v3917_v4 = vld [vmem:[#allocation6] sm:$0xff]   ;;  %v3914_v6 = vld [vmem:[#allocation8 + $0x10] sm:$0xff]   ;;  %v3915_v7 = vld [vmem:[#allocation8 + $0x8] sm:$0xff]  }
  0x38   :  { %3787 = vmatprep.subr.bf16.mxu0 %v3910_v1  ;;  %3801 = vmatprep.mubr.bf16.mxu0 %v3917_v4  ;;  %v3916_v8 = vld [vmem:[#allocation8] sm:$0xff]   ;;  %v3918_v9 = vld [vmem:[#allocation6 + $0x8] sm:$0xff]   ;;  %v3919_v10 = vld [vmem:[#allocation6 + $0x10] sm:$0xff]  }
  0x39   :  { %v3920_v11 = vld [vmem:[#allocation6 + $0x18] sm:$0xff]   ;;  %v3921_v12 = vld [vmem:[#allocation6 + $0x20] sm:$0xff]   ;;  %v3922_v13 = vld [vmem:[#allocation6 + $0x28] sm:$0xff]  }
  0x3a   :  { %v3923_v14 = vld [vmem:[#allocation6 + $0x30] sm:$0xff]   ;;  %v3924_v15 = vld [vmem:[#allocation6 + $0x38] sm:$0xff]   ;;  %v3925_v16 = vld [vmem:[#allocation6 + $0x40] sm:$0xff]  }
  0x3b   :  { %3788 = vmatpush3.bf16.msra.mxu0 %v3910_v1  ;;  %v3926_v17 = vld [vmem:[#allocation6 + $0x48] sm:$0xff]   ;;  %v3927_v18 = vld [vmem:[#allocation6 + $0x50] sm:$0xff]   ;;  %v3928_v19 = vld [vmem:[#allocation6 + $0x58] sm:$0xff]  }
  0x3c   :  { %3789 = vmatprep.subr.bf16.mxu0 %v3911_v2  ;;  %v3929_v20 = vld [vmem:[#allocation6 + $0x60] sm:$0xff]   ;;  %v3930_v21 = vld [vmem:[#allocation6 + $0x68] sm:$0xff]   ;;  %v3931_v22 = vld [vmem:[#allocation6 + $0x70] sm:$0xff]  }
  0x3d   :  { %v3932_v23 = vld [vmem:[#allocation6 + $0x78] sm:$0xff]   ;;  %v3933_v24 = vld [vmem:[#allocation6 + $0x80] sm:$0xff]   ;;  %v3934_v25 = vld [vmem:[#allocation6 + $0x88] sm:$0xff]  }
  0x3e   :  { %v3935_v26 = vld [vmem:[#allocation6 + $0x90] sm:$0xff]   ;;  %v3936_v27 = vld [vmem:[#allocation6 + $0x98] sm:$0xff]   ;;  %v3937_v28 = vld [vmem:[#allocation6 + $0xa0] sm:$0xff]  }
  0x3f   :  { %3790 = vmatpush3.bf16.msra.mxu0 %v3911_v2  ;;  %v3938_v29 = vld [vmem:[#allocation6 + $0xa8] sm:$0xff]   ;;  %v3939_v30 = vld [vmem:[#allocation6 + $0xb0] sm:$0xff]   ;;  %v3940_v31 = vld [vmem:[#allocation6 + $0xb8] sm:$0xff]  }
  0x40   :  { %3791 = vmatprep.subr.bf16.mxu0 %v3912_v3  ;;  %v3941_v32 = vld [vmem:[#allocation6 + $0xc0] sm:$0xff]   ;;  %v3942_v33 = vld [vmem:[#allocation6 + $0xc8] sm:$0xff]   ;;  %v3943_v34 = vld [vmem:[#allocation6 + $0xd0] sm:$0xff]  }
  0x41   :  { %v3944_v36 = vld [vmem:[#allocation6 + $0xd8] sm:$0xff]   ;;  %v3945_v37 = vld [vmem:[#allocation6 + $0xe0] sm:$0xff]   ;;  %v3946_v38 = vld [vmem:[#allocation6 + $0xe8] sm:$0xff]  }
  0x42   :  { %v3947_v39 = vld [vmem:[#allocation6 + $0xf0] sm:$0xff]   ;;  %v3948_v40 = vld [vmem:[#allocation6 + $0xf8] sm:$0xff]   ;;  %v4352_v56 = vld [vmem:[%s4907_s3] ss:$0 sm:$0xff] }
  0x43   :  { %3792 = vmatpush3.bf16.msra.mxu0 %v3912_v3  ;;  %v3951_v41 = vld [vmem:[#allocation3 + $0x4] ss:$16 sps:$4 sm:$0xff]  }
  0x44   :  { %3793 = vmatprep.subr.bf16.mxu0 %v3913_v5 }
  0x47   :  { %3794 = vmatpush3.bf16.msra.mxu0 %v3913_v5 }
  0x48   :  { %3795 = vmatprep.subr.bf16.mxu0 %v3914_v6 }
  0x4b   :  { %3796 = vmatpush3.bf16.msra.mxu0 %v3914_v6 }
  0x4c   :  { %3797 = vmatprep.subr.bf16.mxu0 %v3915_v7 }
  0x4f   :  { %3798 = vmatpush3.bf16.msra.mxu0 %v3915_v7 }
  0x50   :  { %3799 = vmatprep.subr.bf16.mxu0 %v3916_v8 }
  0x53   :  { %3800 = vmatpush3.bf16.msra.mxu0 %v3916_v8 }
  0x54   :  { %1633 = vmatprep.subr.bf16.mxu0 %v4283_v35 }
  0x56   :  { %3802 = vmatmul.mubr.bf16.vlgmr.msra.gmra.mxu0 %v3918_v9 }
  0x57   :  { %3805 = vmatprep.mubr.bf16.mxu0 %v3919_v10 }
  0x5e   :  { %3806 = vmatmul.mubr.bf16.gmra.mxu0 %v3920_v11 }
  0x5f   :  { %3809 = vmatprep.mubr.bf16.mxu0 %v3921_v12 }
  0x66   :  { %3810 = vmatmul.mubr.bf16.gmra.mxu0 %v3922_v13 }
  0x67   :  { %3813 = vmatprep.mubr.bf16.mxu0 %v3923_v14 }
  0x6e   :  { %3814 = vmatmul.mubr.bf16.gmra.mxu0 %v3924_v15 }
  0x6f   :  { %3817 = vmatprep.mubr.bf16.mxu0 %v3925_v16 }
  0x76   :  { %3818 = vmatmul.mubr.bf16.gmra.mxu0 %v3926_v17 }
  0x77   :  { %3821 = vmatprep.mubr.bf16.mxu0 %v3927_v18 }
  0x7e   :  { %3822 = vmatmul.mubr.bf16.gmra.mxu0 %v3928_v19 }
  0x7f   :  { %3825 = vmatprep.mubr.bf16.mxu0 %v3929_v20 }
  0x86   :  { %3826 = vmatmul.mubr.bf16.gmra.mxu0 %v3930_v21 }
  0x87   :  { %3829 = vmatprep.mubr.bf16.mxu0 %v3931_v22 }
  0x8e   :  { %3830 = vmatmul.mubr.bf16.gmra.mxu0 %v3932_v23 }
  0x8f   :  { %3833 = vmatprep.mubr.bf16.mxu0 %v3933_v24 }
  0x96   :  { %3834 = vmatmul.mubr.bf16.gmra.mxu0 %v3934_v25 }
  0x97   :  { %3837 = vmatprep.mubr.bf16.mxu0 %v3935_v26 }
  0x9e   :  { %3838 = vmatmul.mubr.bf16.gmra.mxu0 %v3936_v27 }
  0x9f   :  { %3841 = vmatprep.mubr.bf16.mxu0 %v3937_v28 }
  0xa6   :  { %3842 = vmatmul.mubr.bf16.gmra.mxu0 %v3938_v29 }
  0xa7   :  { %3845 = vmatprep.mubr.bf16.mxu0 %v3939_v30 }
  0xae   :  { %3846 = vmatmul.mubr.bf16.gmra.mxu0 %v3940_v31 }
  0xaf   :  { %3849 = vmatprep.mubr.bf16.mxu0 %v3941_v32 }
  0xb6   :  { %3850 = vmatmul.mubr.bf16.gmra.mxu0 %v3942_v33 }
  0xb7   :  { %3853 = vmatprep.mubr.bf16.mxu0 %v3943_v34 }
  0xbe   :  { %3854 = vmatmul.mubr.bf16.gmra.mxu0 %v3944_v36 }
  0xbf   :  { %3857 = vmatprep.mubr.bf16.mxu0 %v3945_v37 }
  0xc6   :  { %3858 = vmatmul.mubr.bf16.gmra.mxu0 %v3946_v38 }
  0xc7   :  { %3861 = vmatprep.mubr.bf16.mxu0 %v3947_v39 }
  0xce   :  { %3862 = vmatmul.mubr.bf16.gmra.mxu0 %v3948_v40 }
  0xcf   :  { %1665 = vmatprep.mubr.bf16.mxu0 %v3951_v41 }
 0x116   :  { %v4343_v42 = vpop.f32.mrf.mxu0 }
 0x117   :  { %v523_v25 = vadd.f32 %v4343_v42, %v4352_v56 }
 0x118   :  { %v4345_v43 = vpop.f32.mrf.mxu0 }
 0x119   :  { %v515_v30 = vadd.f32 %v4352_v56, %v4345_v43  ;;  %v3993_v43 = vld [vmem:[#allocation3 + $0x144] ss:$16 sps:$4 sm:$0xff]  }
 0x11a   :  { %v3804_v44 = vpop.f32.mrf.mxu0  ;;  %1745 = vmatprep.mubr.bf16.mxu1 %v3993_v43 }
 0x11b   :  { %v526_v22 = vadd.f32 %v3804_v44, %v4352_v56 }
 0x11c   :  { %v4347_v45 = vpop.f32.mrf.mxu0 }
 0x11d   :  { %v770_v27 = vpack.c.bf16 %v526_v22, %v523_v25  ;;  %v518_v28 = vadd.f32 %v4352_v56, %v4347_v45 }
 0x11e   :  { %v3807_v46 = vpop.f32.mrf.mxu0 }
 0x11f   :  { %v539_v15 = vadd.f32 %v3807_v46, %v4352_v56  ;;  %v769_v32 = vpack.c.bf16 %v518_v28, %v515_v30  ;;  %v3954_v28 = vld [vmem:[#allocation3 + $0x20] ss:$16 sps:$4 sm:$0xff]  }
 0x120   :  { %v530_v47 = vpop.f32.mrf.mxu0  ;;  %v3999_v30 = vld [vmem:[#allocation3 + $0x160] ss:$16 sps:$4 sm:$0xff]  }
 0x121   :  { %v531_v20 = vadd.f32 %v4352_v56, %v530_v47 }
 0x122   :  { %v3808_v48 = vpop.f32.mrf.mxu0 }
 0x123   :  { %v542_v12 = vadd.f32 %v3808_v48, %v4352_v56 }
 0x124   :  { %v533_v49 = vpop.f32.mrf.mxu0 }
 0x125   :  { %v772_v17 = vpack.c.bf16 %v542_v12, %v539_v15  ;;  %v534_v18 = vadd.f32 %v4352_v56, %v533_v49  ;;  %v3949_v15 = vld [vmem:[#allocation3] ss:$16 sps:$4 sm:$0xff]  }
 0x126   :  { %v3811_v50 = vpop.f32.mrf.mxu0 }
 0x127   :  { %v555_v5 = vadd.f32 %v3811_v50, %v4352_v56  ;;  %v771_v23 = vpack.c.bf16 %v534_v18, %v531_v20  ;;  %v3997_v20 = vld [vmem:[#allocation3 + $0x164] ss:$16 sps:$4 sm:$0xff]  }
 0x128   :  { %v546_v51 = vpop.f32.mrf.mxu0 }
 0x129   :  { %v547_v10 = vadd.f32 %v4352_v56, %v546_v51 }
 0x12a   :  { %v3812_v52 = vpop.f32.mrf.mxu0 }
 0x12b   :  { %v558_v2 = vadd.f32 %v3812_v52, %v4352_v56 }
 0x12c   :  { %v549_v53 = vpop.f32.mrf.mxu0 }
 0x12d   :  { %v774_v7 = vpack.c.bf16 %v558_v2, %v555_v5  ;;  %v550_v8 = vadd.f32 %v4352_v56, %v549_v53 }
 0x12e   :  { %v3815_v54 = vpop.f32.mrf.mxu0 }
 0x12f   :  { %v571_v58 = vadd.f32 %v3815_v54, %v4352_v56  ;;  %v773_v13 = vpack.c.bf16 %v550_v8, %v547_v10 }
 0x130   :  { %v562_v55 = vpop.f32.mrf.mxu0 }
 0x131   :  { %v563_v0 = vadd.f32 %v4352_v56, %v562_v55 }
 0x132   :  { %v3816_v57 = vpop.f32.mrf.mxu0 }
 0x133   :  { %v574_v59 = vadd.f32 %v3816_v57, %v4352_v56 }
 0x134   :  { %v565_v60 = vpop.f32.mrf.mxu0 }
 0x135   :  { %v776_v61 = vpack.c.bf16 %v574_v59, %v571_v58  ;;  %v566_v62 = vadd.f32 %v4352_v56, %v565_v60 }
 0x136   :  { %v4357_v63 = vpop.f32.mrf.mxu0 }
 0x137   :  { %1634 = vmatpush1.bf16.msra.mxu0 %v776_v61  ;;  %3881 = vmatpush1.bf16.msra.mxu1 %v776_v61  ;;  %v775_v3 = vpack.c.bf16 %v566_v62, %v563_v0  ;;  %v587_v8 = vadd.f32 %v4357_v63, %v4352_v56 }
 0x138   :  { %v4360_v1 = vpop.f32.mrf.mxu0  ;;  %1635 = vmatprep.subr.bf16.mxu0 %v4283_v35  ;;  %3866 = vmatprep.subr.bf16.mxu1 %v4283_v35 }
 0x13a   :  { %v4365_v4 = vpop.f32.mrf.mxu0 }
 0x13b   :  { %1636 = vmatpush1.bf16.msra.mxu0 %v775_v3  ;;  %3882 = vmatpush1.bf16.msra.mxu1 %v775_v3  ;;  %v590_v3 = vadd.f32 %v4365_v4, %v4352_v56  ;;  %v579_v4 = vadd.f32 %v4352_v56, %v4360_v1  ;;  %v3952_v1 = vld [vmem:[#allocation3 + $0x24] ss:$16 sps:$4 sm:$0xff]  }
 0x13c   :  { %v4368_v6 = vpop.f32.mrf.mxu0  ;;  %1637 = vmatprep.subr.bf16.mxu0 %v4283_v35  ;;  %3867 = vmatprep.subr.bf16.mxu1 %v4283_v35 }
 0x13d   :  { %v778_v10 = vpack.c.bf16 %v590_v3, %v587_v8  ;;  %v4011_v3 = vld [vmem:[#allocation3 + $0x1a0] ss:$16 sps:$4 sm:$0xff]  }
 0x13e   :  { %v4373_v9 = vpop.f32.mrf.mxu0 }
 0x13f   :  { %1638 = vmatpush1.bf16.msra.mxu0 %v774_v7  ;;  %3883 = vmatpush1.bf16.msra.mxu1 %v774_v7  ;;  %v603_v58 = vadd.f32 %v4373_v9, %v4352_v56 }
 0x140   :  { %v4376_v11 = vpop.f32.mrf.mxu0  ;;  %1639 = vmatprep.subr.bf16.mxu0 %v4283_v35  ;;  %3868 = vmatprep.subr.bf16.mxu1 %v4283_v35 }
 0x141   :  { %v595_v0 = vadd.f32 %v4352_v56, %v4376_v11  ;;  %v582_v11 = vadd.f32 %v4352_v56, %v4368_v6 }
 0x142   :  { %v4381_v14 = vpop.f32.mrf.mxu0 }
 0x143   :  { %1640 = vmatpush1.bf16.msra.mxu0 %v773_v13  ;;  %3884 = vmatpush1.bf16.msra.mxu1 %v773_v13  ;;  %v606_v54 = vadd.f32 %v4381_v14, %v4352_v56  ;;  %v777_v13 = vpack.c.bf16 %v582_v11, %v579_v4  ;;  %v3963_v4 = vld [vmem:[#allocation3 + $0x80] ss:$16 sps:$4 sm:$0xff]  }
 0x144   :  { %v4384_v16 = vpop.f32.mrf.mxu0  ;;  %1641 = vmatprep.subr.bf16.mxu0 %v4283_v35  ;;  %3869 = vmatprep.subr.bf16.mxu1 %v4283_v35 }
 0x145   :  { %v780_v60 = vpack.c.bf16 %v606_v54, %v603_v58  ;;  %v598_v61 = vadd.f32 %v4352_v56, %v4384_v16  ;;  %v4009_v54 = vld [vmem:[#allocation3 + $0x1a4] ss:$16 sps:$4 sm:$0xff]  }
 0x146   :  { %v3827_v19 = vpop.f32.mrf.mxu0 }
 0x147   :  { %1642 = vmatpush1.bf16.msra.mxu0 %v772_v17  ;;  %3885 = vmatpush1.bf16.msra.mxu1 %v772_v17  ;;  %v619_v47 = vadd.f32 %v3827_v19, %v4352_v56  ;;  %v779_v5 = vpack.c.bf16 %v598_v61, %v595_v0  ;;  %v3991_v17 = vld [vmem:[#allocation3 + $0x140] ss:$16 sps:$4 sm:$0xff]  }
 0x148   :  { %v610_v21 = vpop.f32.mrf.mxu0  ;;  %1643 = vmatprep.subr.bf16.mxu0 %v4283_v35  ;;  %3870 = vmatprep.subr.bf16.mxu1 %v4283_v35  ;;  %v3960_v0 = vld [vmem:[#allocation3 + $0x60] ss:$16 sps:$4 sm:$0xff]  }
 0x149   :  { %v611_v52 = vadd.f32 %v4352_v56, %v610_v21 }
 0x14a   :  { %v3828_v24 = vpop.f32.mrf.mxu0 }
 0x14b   :  { %1644 = vmatpush1.bf16.msra.mxu0 %v771_v23  ;;  %3886 = vmatpush1.bf16.msra.mxu1 %v771_v23  ;;  %v622_v44 = vadd.f32 %v3828_v24, %v4352_v56 }
 0x14c   :  { %v613_v26 = vpop.f32.mrf.mxu0  ;;  %1645 = vmatprep.subr.bf16.mxu0 %v4283_v35  ;;  %3871 = vmatprep.subr.bf16.mxu1 %v4283_v35 }
 0x14d   :  { %v782_v49 = vpack.c.bf16 %v622_v44, %v619_v47  ;;  %v614_v50 = vadd.f32 %v4352_v56, %v613_v26 }
 0x14e   :  { %v3831_v29 = vpop.f32.mrf.mxu0 }
 0x14f   :  { %1646 = vmatpush1.bf16.msra.mxu0 %v770_v27  ;;  %3887 = vmatpush1.bf16.msra.mxu1 %v770_v27  ;;  %v635_v34 = vadd.f32 %v3831_v29, %v4352_v56  ;;  %v781_v55 = vpack.c.bf16 %v614_v50, %v611_v52  ;;  %v3958_v50 = vld [vmem:[#allocation3 + $0x64] ss:$16 sps:$4 sm:$0xff]  }
 0x150   :  { %v626_v31 = vpop.f32.mrf.mxu0  ;;  %1647 = vmatprep.subr.bf16.mxu0 %v4283_v35  ;;  %3872 = vmatprep.subr.bf16.mxu1 %v4283_v35 }
 0x151   :  { %v627_v41 = vadd.f32 %v4352_v56, %v626_v31  ;;  %v3955_v31 = vld [vmem:[#allocation3 + $0x44] ss:$16 sps:$4 sm:$0xff]  }
 0x152   :  { %v3832_v33 = vpop.f32.mrf.mxu0 }
 0x153   :  { %v638_v36 = vadd.f32 %v3832_v33, %v4352_v56  ;;  %1648 = vmatpush1.bf16.msra.mxu0 %v769_v32  ;;  %3888 = vmatpush1.bf16.msra.mxu1 %v769_v32  ;;  %v4003_v33 = vld [vmem:[#allocation3 + $0x184] ss:$16 sps:$4 sm:$0xff]  }
 0x154   :  { %v629_v37 = vpop.f32.mrf.mxu0  ;;  %1649 = vmatprep.subr.bf16.mxu0 %v4283_v35  ;;  %3873 = vmatprep.subr.bf16.mxu1 %v4283_v35 }
 0x155   :  { %v784_v38 = vpack.c.bf16 %v638_v36, %v635_v34  ;;  %v630_v39 = vadd.f32 %v4352_v56, %v629_v37 }
 0x156   :  { %v4408_v40 = vpop.f32.mrf.mxu0 }
 0x157   :  { %1650 = vmatpush2.bf16.msra.mxu0 %v784_v38  ;;  %3889 = vmatpush2.bf16.msra.mxu1 %v784_v38  ;;  %v783_v45 = vpack.c.bf16 %v630_v39, %v627_v41  ;;  %v651_v61 = vadd.f32 %v4408_v40, %v4352_v56 }
 0x158   :  { %1651 = vmatprep.subr.bf16.mxu0 %v4283_v35  ;;  %3874 = vmatprep.subr.bf16.mxu1 %v4283_v35  ;;  %v4413_v42 = vpop.f32.mrf.mxu0 }
 0x159   :  { %v643_v8 = vadd.f32 %v4352_v56, %v4413_v42  ;;  %v3964_v42 = vld [vmem:[#allocation3 + $0xa4] ss:$16 sps:$4 sm:$0xff]  }
 0x15a   :  { %v4416_v46 = vpop.f32.mrf.mxu0 }
 0x15b   :  { %1652 = vmatpush2.bf16.msra.mxu0 %v783_v45  ;;  %3890 = vmatpush2.bf16.msra.mxu1 %v783_v45  ;;  %v3957_v45 = vld [vmem:[#allocation3 + $0x40] ss:$16 sps:$4 sm:$0xff]  }
 0x15c   :  { %1653 = vmatprep.subr.bf16.mxu0 %v4283_v35  ;;  %3875 = vmatprep.subr.bf16.mxu1 %v4283_v35  ;;  %v4421_v48 = vpop.f32.mrf.mxu0 }
 0x15d   :  { %v646_v40 = vadd.f32 %v4352_v56, %v4421_v48 }
 0x15e   :  { %v4424_v51 = vpop.f32.mrf.mxu0 }
 0x15f   :  { %1654 = vmatpush2.bf16.msra.mxu0 %v782_v49  ;;  %3891 = vmatpush2.bf16.msra.mxu1 %v782_v49  ;;  %v667_v41 = vadd.f32 %v4424_v51, %v4352_v56  ;;  %v4005_v49 = vld [vmem:[#allocation3 + $0x180] ss:$16 sps:$4 sm:$0xff]   ;;  %v785_v11 = vpack.c.bf16 %v646_v40, %v643_v8  ;;  %v4063_v8 = vld [vmem:[#allocation3 + $0x2a4] ss:$16 sps:$4 sm:$0xff]  }
 0x160   :  { %1655 = vmatprep.subr.bf16.mxu0 %v4283_v35  ;;  %3876 = vmatprep.subr.bf16.mxu1 %v4283_v35  ;;  %v4429_v53 = vpop.f32.mrf.mxu0  ;;  %v4065_v40 = vld [vmem:[#allocation3 + $0x2a0] ss:$16 sps:$4 sm:$0xff]  }
 0x162   :  { %v4433_v57 = vpop.f32.mrf.mxu0 }
 0x163   :  { %1656 = vmatpush2.bf16.msra.mxu0 %v781_v55  ;;  %3892 = vmatpush2.bf16.msra.mxu1 %v781_v55  ;;  %v670_v43 = vadd.f32 %v4433_v57, %v4352_v56  ;;  %v659_v55 = vadd.f32 %v4352_v56, %v4429_v53 }
 0x164   :  { %1657 = vmatprep.subr.bf16.mxu0 %v4283_v35  ;;  %3877 = vmatprep.subr.bf16.mxu1 %v4283_v35  ;;  %v4439_v59 = vpop.f32.mrf.mxu0 }
 0x165   :  { %v788_v58 = vpack.c.bf16 %v670_v43, %v667_v41  ;;  %v662_v51 = vadd.f32 %v4352_v56, %v4439_v59  ;;  %v3961_v59 = vld [vmem:[#allocation3 + $0x84] ss:$16 sps:$4 sm:$0xff]   ;;  %v4029_v41 = vld [vmem:[#allocation3 + $0x200] ss:$16 sps:$4 sm:$0xff]  }
 0x166   :  { %v3843_v62 = vpop.f32.mrf.mxu0  ;;  %v3970_v43 = vld [vmem:[#allocation3 + $0xe4] ss:$16 sps:$4 sm:$0xff]  }
 0x167   :  { %1658 = vmatpush2.bf16.msra.mxu0 %v780_v60  ;;  %3893 = vmatpush2.bf16.msra.mxu1 %v780_v60  ;;  %v683_v26 = vadd.f32 %v3843_v62, %v4352_v56  ;;  %v654_v62 = vadd.f32 %v4416_v46, %v4352_v56  ;;  %v787_v53 = vpack.c.bf16 %v662_v51, %v659_v55  ;;  %v3972_v55 = vld [vmem:[#allocation3 + $0xe0] ss:$16 sps:$4 sm:$0xff]  }
 0x168   :  { %1659 = vmatprep.subr.bf16.mxu0 %v4283_v35  ;;  %3878 = vmatprep.subr.bf16.mxu1 %v4283_v35  ;;  %v674_v2 = vpop.f32.mrf.mxu0 }
 0x169   :  { %v675_v34 = vadd.f32 %v4352_v56, %v674_v2 }
 0x16a   :  { %v3844_v7 = vpop.f32.mrf.mxu0 }
 0x16b   :  { %1660 = vmatpush2.bf16.msra.mxu0 %v779_v5  ;;  %3894 = vmatpush2.bf16.msra.mxu1 %v779_v5  ;;  %v686_v27 = vadd.f32 %v3844_v7, %v4352_v56  ;;  %v4015_v7 = vld [vmem:[#allocation3 + $0x1c4] ss:$16 sps:$4 sm:$0xff]  }
 0x16c   :  { %1661 = vmatprep.subr.bf16.mxu0 %v4283_v35  ;;  %3879 = vmatprep.subr.bf16.mxu1 %v4283_v35  ;;  %v677_v9 = vpop.f32.mrf.mxu0 }
 0x16d   :  { %v790_v36 = vpack.c.bf16 %v686_v27, %v683_v26  ;;  %v678_v37 = vadd.f32 %v4352_v56, %v677_v9  ;;  %v786_v9 = vpack.c.bf16 %v654_v62, %v651_v61  ;;  %v4041_v61 = vld [vmem:[#allocation3 + $0x240] ss:$16 sps:$4 sm:$0xff]   ;;  %v3976_v62 = vld [vmem:[#allocation3 + $0x124] ss:$16 sps:$4 sm:$0xff]  }
 0x16e   :  { %v3847_v12 = vpop.f32.mrf.mxu0 }
 0x16f   :  { %1662 = vmatpush2.bf16.msra.mxu0 %v778_v10  ;;  %3895 = vmatpush2.bf16.msra.mxu1 %v778_v10  ;;  %v699_v14 = vadd.f32 %v3847_v12, %v4352_v56  ;;  %v789_v44 = vpack.c.bf16 %v678_v37, %v675_v34  ;;  %v3969_v37 = vld [vmem:[#allocation3 + $0xc0] ss:$16 sps:$4 sm:$0xff]  }
 0x170   :  { %1663 = vmatprep.subr.bf16.mxu0 %v4283_v35  ;;  %3880 = vmatprep.subr.bf16.mxu1 %v4283_v35  ;;  %v690_v63 = vpop.f32.mrf.mxu0 }
 0x171   :  { %v691_v6 = vadd.f32 %v4352_v56, %v690_v63 }
 0x172   :  { %v3848_v16 = vpop.f32.mrf.mxu0 }
 0x173   :  { %1664 = vmatpush2.bf16.msra.mxu0 %v777_v13  ;;  %3896 = vmatpush2.bf16.msra.mxu1 %v777_v13  ;;  %v702_v18 = vadd.f32 %v3848_v16, %v4352_v56  ;;  %v4017_v13 = vld [vmem:[#allocation3 + $0x1c0] ss:$16 sps:$4 sm:$0xff]   ;;  %v4021_v16 = vld [vmem:[#allocation3 + $0x1e4] ss:$16 sps:$4 sm:$0xff]  }
 0x174   :  { %v693_v19 = vpop.f32.mrf.mxu0  ;;  %1922 = vmatprep.subr.bf16.mxu0 %v4283_v35 }
 0x175   :  { %v792_v21 = vpack.c.bf16 %v702_v18, %v699_v14  ;;  %v694_v22 = vadd.f32 %v4352_v56, %v693_v19 }
 0x176   :  { %1666 = vmatmul.mubr.bf16.vlgmr.msra.gmra.mxu0 %v3949_v15  ;;  %v4464_v23 = vpop.f32.mrf.mxu0  ;;  %1746 = vmatmul.mubr.bf16.vlgmr.msra.gmra.mxu1 %v3991_v17 }
 0x177   :  { %1673 = vmatprep.mubr.bf16.mxu0 %v3952_v1  ;;  %v791_v24 = vpack.c.bf16 %v694_v22, %v691_v6  ;;  %1923 = vmatpush1.bf16.msra.mxu0 %v792_v21  ;;  %v4023_v21 = vld [vmem:[#allocation3 + $0x1e0] ss:$16 sps:$4 sm:$0xff]   ;;  %v3967_v22 = vld [vmem:[#allocation3 + $0xc4] ss:$16 sps:$4 sm:$0xff]  }
 0x178   :  { %1924 = vmatprep.subr.bf16.mxu0 %v4283_v35  ;;  %v4467_v25 = vpop.f32.mrf.mxu0  ;;  %1753 = vmatprep.mubr.bf16.mxu1 %v3997_v20  ;;  %v3966_v20 = vld [vmem:[#allocation3 + $0xa0] ss:$16 sps:$4 sm:$0xff]  }
 0x179   :  { %v707_v51 = vadd.f32 %v4352_v56, %v4467_v25  ;;  %v4060_v25 = vld [vmem:[#allocation9 + $0x60] ss:$8 sps:$4 sm:$0xff]  }
 0x17a   :  { %v4471_v29 = vpop.f32.mrf.mxu0 }
 0x17b   :  { %1925 = vmatpush1.bf16.msra.mxu0 %v791_v24  ;;  %v4027_v24 = vld [vmem:[#allocation3 + $0x204] ss:$16 sps:$4 sm:$0xff]  }
 0x17c   :  { %1926 = vmatprep.subr.bf16.mxu0 %v4283_v35  ;;  %v4474_v32 = vpop.f32.mrf.mxu0 }
 0x17e   :  { %1674 = vmatmul.mubr.bf16.gmra.mxu0 %v3954_v28  ;;  %v4478_v38 = vpop.f32.mrf.mxu0  ;;  %1754 = vmatmul.mubr.bf16.gmra.mxu1 %v3999_v30  ;;  %v4042_v30 = vld [vmem:[#allocation9 + $0x70] ss:$8 sps:$4 sm:$0xff]  }
 0x17f   :  { %1681 = vmatprep.mubr.bf16.mxu0 %v3955_v31  ;;  %1927 = vmatpush1.bf16.msra.mxu0 %v790_v36  ;;  %v4044_v31 = vld [vmem:[#allocation9 + $0x74] ss:$8 sps:$4 sm:$0xff]  }
 0x180   :  { %1928 = vmatprep.subr.bf16.mxu0 %v4283_v35  ;;  %v4481_v39 = vpop.f32.mrf.mxu0  ;;  %1761 = vmatprep.mubr.bf16.mxu1 %v4003_v33  ;;  %v731_v33 = vadd.f32 %v4478_v38, %v4352_v56 }
 0x181   :  { %2610 = vmatprep.subr.bf16.mxu1 %v4044_v31  ;;  %v4105_v31 = vld [vmem:[#allocation3 + $0x364] ss:$16 sps:$4 sm:$0xff]  }
 0x182   :  { %v4487_v47 = vpop.f32.mrf.mxu0  ;;  %2611 = vmatpush1.bf16.msra.mxu1 %v4042_v30  ;;  %v4014_v30 = vld [vmem:[#allocation3 + $0xec] ss:$16 sps:$4 sm:$0xff]  }
 0x183   :  { %1929 = vmatpush1.bf16.msra.mxu0 %v789_v44  ;;  %v734_v34 = vadd.f32 %v4487_v47, %v4352_v56  ;;  %v4033_v44 = vld [vmem:[#allocation3 + $0x224] ss:$16 sps:$4 sm:$0xff]   ;;  %v715_v47 = vadd.f32 %v4464_v23, %v4352_v56 }
 0x184   :  { %1930 = vmatprep.subr.bf16.mxu0 %v4283_v35  ;;  %v4490_v52 = vpop.f32.mrf.mxu0 }
 0x185   :  { %v726_v38 = vadd.f32 %v4352_v56, %v4490_v52  ;;  %v4039_v52 = vld [vmem:[#allocation3 + $0x244] ss:$16 sps:$4 sm:$0xff]  }
 0x186   :  { %1682 = vmatmul.mubr.bf16.gmra.mxu0 %v3957_v45  ;;  %v3859_v57 = vpop.f32.mrf.mxu0  ;;  %1762 = vmatmul.mubr.bf16.gmra.mxu1 %v4005_v49  ;;  %v723_v45 = vadd.f32 %v4352_v56, %v4481_v39  ;;  %v796_v49 = vpack.c.bf16 %v734_v34, %v731_v33  ;;  %v4035_v39 = vld [vmem:[#allocation3 + $0x220] ss:$16 sps:$4 sm:$0xff]   ;;  %v4122_v34 = vld [vmem:[#allocation9 + $0x34] ss:$8 sps:$4 sm:$0xff]  }
 0x187   :  { %1689 = vmatprep.mubr.bf16.mxu0 %v3958_v50  ;;  %1931 = vmatpush1.bf16.msra.mxu0 %v788_v58  ;;  %v747_v1 = vadd.f32 %v3859_v57, %v4352_v56  ;;  %v718_v50 = vadd.f32 %v4471_v29, %v4352_v56  ;;  %v3973_v58 = vld [vmem:[#allocation3 + $0x104] ss:$16 sps:$4 sm:$0xff]   ;;  %v3975_v29 = vld [vmem:[#allocation3 + $0x100] ss:$16 sps:$4 sm:$0xff]  }
 0x188   :  { %1932 = vmatprep.subr.bf16.mxu0 %v4283_v35  ;;  %v738_v60 = vpop.f32.mrf.mxu0  ;;  %1769 = vmatprep.mubr.bf16.mxu1 %v4009_v54  ;;  %v795_v54 = vpack.c.bf16 %v726_v38, %v723_v45  ;;  %v4120_v33 = vld [vmem:[#allocation9 + $0x30] ss:$8 sps:$4 sm:$0xff]   ;;  %v4117_v38 = vld [vmem:[#allocation3 + $0x3a4] ss:$16 sps:$4 sm:$0xff]  }
 0x189   :  { %v739_v26 = vadd.f32 %v4352_v56, %v738_v60  ;;  %v794_v57 = vpack.c.bf16 %v718_v50, %v715_v47  ;;  %v710_v60 = vadd.f32 %v4352_v56, %v4474_v32  ;;  %v4050_v32 = vld [vmem:[#allocation3 + $0x260] ss:$16 sps:$4 sm:$0xff]   ;;  %v4131_v47 = vld [vmem:[#allocation9 + $0x24] ss:$8 sps:$4 sm:$0xff]  }
 0x18a   :  { %v3860_v2 = vpop.f32.mrf.mxu0  ;;  %v4113_v45 = vld [vmem:[#allocation3 + $0x380] ss:$16 sps:$4 sm:$0xff]  }
 0x18b   :  { %1933 = vmatpush1.bf16.msra.mxu0 %v787_v53  ;;  %v750_v19 = vadd.f32 %v3860_v2, %v4352_v56  ;;  %v793_v23 = vpack.c.bf16 %v710_v60, %v707_v51  ;;  %v4048_v53 = vld [vmem:[#allocation3 + $0x264] ss:$16 sps:$4 sm:$0xff]   ;;  %v3981_v2 = vld [vmem:[#allocation3 + $0xc] ss:$16 sps:$4 sm:$0xff]   ;;  %v4129_v50 = vld [vmem:[#allocation9 + $0x20] ss:$8 sps:$4 sm:$0xff]  }
 0x18c   :  { %1934 = vmatprep.subr.bf16.mxu0 %v4283_v35  ;;  %v741_v5 = vpop.f32.mrf.mxu0  ;;  %v4126_v51 = vld [vmem:[#allocation3 + $0x3c4] ss:$16 sps:$4 sm:$0xff]   ;;  %v4141_v60 = vld [vmem:[#allocation9] ss:$8 sps:$4 sm:$0xff]  }
 0x18d   :  { %v798_v27 = vpack.c.bf16 %v750_v19, %v747_v1  ;;  %v742_v28 = vadd.f32 %v4352_v56, %v741_v5  ;;  %v4056_v5 = vld [vmem:[#allocation3 + $0x280] ss:$16 sps:$4 sm:$0xff]   ;;  %v4101_v1 = vld [vmem:[#allocation9 + $0x44] ss:$8 sps:$4 sm:$0xff]  }
 0x18e   :  { %1690 = vmatmul.mubr.bf16.gmra.mxu0 %v3960_v0  ;;  %v3863_v10 = vpop.f32.mrf.mxu0  ;;  %1770 = vmatmul.mubr.bf16.gmra.mxu1 %v4011_v3  ;;  %v4062_v0 = vld [vmem:[#allocation9 + $0x64] ss:$8 sps:$4 sm:$0xff]  }
 0x18f   :  { %1697 = vmatprep.mubr.bf16.mxu0 %v3961_v59  ;;  %1935 = vmatpush1.bf16.msra.mxu0 %v786_v9  ;;  %v763_v12 = vadd.f32 %v3863_v10, %v4352_v56  ;;  %v797_v36 = vpack.c.bf16 %v742_v28, %v739_v26  ;;  %v4054_v3 = vld [vmem:[#allocation3 + $0x284] ss:$16 sps:$4 sm:$0xff]   ;;  %v3979_v59 = vld [vmem:[#allocation3 + $0x8] ss:$16 sps:$4 sm:$0xff]   ;;  %v3987_v10 = vld [vmem:[#allocation3 + $0x4c] ss:$16 sps:$4 sm:$0xff]  }
 0x190   :  { %1936 = vmatprep.subr.bf16.mxu0 %v4283_v35  ;;  %v754_v46 = vpop.f32.mrf.mxu0  ;;  %1777 = vmatprep.mubr.bf16.mxu1 %v4015_v7  ;;  %v3982_v7 = vld [vmem:[#allocation3 + $0x2c] ss:$16 sps:$4 sm:$0xff]   ;;  %v3984_v9 = vld [vmem:[#allocation3 + $0x28] ss:$16 sps:$4 sm:$0xff]   ;;  %v4096_v26 = vld [vmem:[#allocation3 + $0x344] ss:$16 sps:$4 sm:$0xff]  }
 0x191   :  { %v755_v14 = vadd.f32 %v4352_v56, %v754_v46  ;;  %2612 = vmatprep.subr.bf16.mxu1 %v4062_v0  ;;  %v4069_v46 = vld [vmem:[#allocation3 + $0x2c4] ss:$16 sps:$4 sm:$0xff]   ;;  %v4002_v19 = vld [vmem:[#allocation3 + $0xac] ss:$16 sps:$4 sm:$0xff]   ;;  %v4098_v28 = vld [vmem:[#allocation3 + $0x340] ss:$16 sps:$4 sm:$0xff]  }
 0x192   :  { %v3864_v63 = vpop.f32.mrf.mxu0  ;;  %2613 = vmatpush1.bf16.msra.mxu1 %v4060_v25  ;;  %v4137_v25 = vld [vmem:[#allocation3 + $0x3e0] ss:$16 sps:$4 sm:$0xff]   ;;  %v4047_v0 = vld [vmem:[#allocation3 + $0x18c] ss:$16 sps:$4 sm:$0xff]  }
 0x193   :  { %1937 = vmatpush1.bf16.msra.mxu0 %v785_v11  ;;  %v766_v48 = vadd.f32 %v3864_v63, %v4352_v56  ;;  %v4080_v11 = vld [vmem:[#allocation9 + $0x54] ss:$8 sps:$4 sm:$0xff]   ;;  %v4071_v63 = vld [vmem:[#allocation3 + $0x2c0] ss:$16 sps:$4 sm:$0xff]  }
 0x194   :  { %v757_v15 = vpop.f32.mrf.mxu0  ;;  %1938 = vmatprep.subr.bf16.mxu0 %v4283_v35  ;;  %2614 = vmatprep.subr.bf16.mxu1 %v4080_v11 }
 0x195   :  { %v800_v17 = vpack.c.bf16 %v766_v48, %v763_v12  ;;  %v758_v6 = vadd.f32 %v4352_v56, %v757_v15  ;;  %v3978_v56 = vld [vmem:[#allocation3 + $0x120] ss:$16 sps:$4 sm:$0xff]   ;;  %v3996_v15 = vld [vmem:[#allocation3 + $0x8c] ss:$16 sps:$4 sm:$0xff]  }
 0x196   :  { %1698 = vmatmul.mubr.bf16.gmra.mxu0 %v3963_v4  ;;  %1778 = vmatmul.mubr.bf16.gmra.mxu1 %v4017_v13  ;;  %v4078_v12 = vld [vmem:[#allocation9 + $0x50] ss:$8 sps:$4 sm:$0xff]   ;;  %v3990_v13 = vld [vmem:[#allocation3 + $0x6c] ss:$16 sps:$4 sm:$0xff]  }
 0x197   :  { %1705 = vmatprep.mubr.bf16.mxu0 %v3964_v42  ;;  %v799_v18 = vpack.c.bf16 %v758_v6, %v755_v14  ;;  %1939 = vmatpush2.bf16.msra.mxu0 %v800_v17  ;;  %v3985_v4 = vld [vmem:[#allocation3 + $0x48] ss:$16 sps:$4 sm:$0xff]   ;;  %v4075_v42 = vld [vmem:[#allocation3 + $0x2e4] ss:$16 sps:$4 sm:$0xff]   ;;  %v4077_v48 = vld [vmem:[#allocation3 + $0x2e0] ss:$16 sps:$4 sm:$0xff]  }
 0x198   :  { %1940 = vmatprep.subr.bf16.mxu0 %v4283_v35  ;;  %1785 = vmatprep.mubr.bf16.mxu1 %v4021_v16  ;;  %v3988_v14 = vld [vmem:[#allocation3 + $0x68] ss:$16 sps:$4 sm:$0xff]   ;;  %v4084_v16 = vld [vmem:[#allocation3 + $0x304] ss:$16 sps:$4 sm:$0xff]   ;;  %v4086_v6 = vld [vmem:[#allocation3 + $0x300] ss:$16 sps:$4 sm:$0xff]  }
 0x199   :  { %2615 = vmatpush1.bf16.msra.mxu1 %v4078_v12  ;;  %v3994_v17 = vld [vmem:[#allocation3 + $0x88] ss:$16 sps:$4 sm:$0xff]   ;;  %v4074_v12 = vld [vmem:[#allocation3 + $0x20c] ss:$16 sps:$4 sm:$0xff]  }
 0x19a   :  { %2616 = vmatprep.subr.bf16.mxu1 %v4101_v1 }
 0x19b   :  { %1941 = vmatpush2.bf16.msra.mxu0 %v799_v18  ;;  %v4099_v18 = vld [vmem:[#allocation9 + $0x40] ss:$8 sps:$4 sm:$0xff]  }
 0x19c   :  { %1942 = vmatprep.subr.bf16.mxu0 %v4283_v35 }
 0x19d   :  { %2617 = vmatpush1.bf16.msra.mxu1 %v4099_v18 }
 0x19e   :  { %1706 = vmatmul.mubr.bf16.gmra.mxu0 %v3966_v20  ;;  %1786 = vmatmul.mubr.bf16.gmra.mxu1 %v4023_v21  ;;  %v4090_v20 = vld [vmem:[#allocation3 + $0x324] ss:$16 sps:$4 sm:$0xff]   ;;  %v4000_v21 = vld [vmem:[#allocation3 + $0xa8] ss:$16 sps:$4 sm:$0xff]  }
 0x19f   :  { %1713 = vmatprep.mubr.bf16.mxu0 %v3967_v22  ;;  %1943 = vmatpush2.bf16.msra.mxu0 %v798_v27  ;;  %v4092_v22 = vld [vmem:[#allocation3 + $0x320] ss:$16 sps:$4 sm:$0xff]   ;;  %v4006_v27 = vld [vmem:[#allocation3 + $0xc8] ss:$16 sps:$4 sm:$0xff]  }
 0x1a0   :  { %1944 = vmatprep.subr.bf16.mxu0 %v4283_v35  ;;  %1793 = vmatprep.mubr.bf16.mxu1 %v4027_v24  ;;  %v4008_v24 = vld [vmem:[#allocation3 + $0xcc] ss:$16 sps:$4 sm:$0xff]  }
 0x1a1   :  { %2618 = vmatprep.subr.bf16.mxu1 %v4122_v34 }
 0x1a2   :  { %2619 = vmatpush1.bf16.msra.mxu1 %v4120_v33 }
 0x1a3   :  { %1945 = vmatpush2.bf16.msra.mxu0 %v797_v36  ;;  %v4012_v36 = vld [vmem:[#allocation3 + $0xe8] ss:$16 sps:$4 sm:$0xff]   ;;  %2620 = vmatprep.subr.bf16.mxu1 %v4131_v47 }
 0x1a4   :  { %1946 = vmatprep.subr.bf16.mxu0 %v4283_v35 }
 0x1a6   :  { %1714 = vmatmul.mubr.bf16.gmra.mxu0 %v3969_v37  ;;  %1794 = vmatmul.mubr.bf16.gmra.mxu1 %v4029_v41  ;;  %v4107_v37 = vld [vmem:[#allocation3 + $0x360] ss:$16 sps:$4 sm:$0xff]   ;;  %v4020_v41 = vld [vmem:[#allocation3 + $0x10c] ss:$16 sps:$4 sm:$0xff]  }
 0x1a7   :  { %1721 = vmatprep.mubr.bf16.mxu0 %v3970_v43  ;;  %1947 = vmatpush2.bf16.msra.mxu0 %v796_v49  ;;  %v4111_v43 = vld [vmem:[#allocation3 + $0x384] ss:$16 sps:$4 sm:$0xff]   ;;  %v4026_v49 = vld [vmem:[#allocation3 + $0x12c] ss:$16 sps:$4 sm:$0xff]  }
 0x1a8   :  { %1948 = vmatprep.subr.bf16.mxu0 %v4283_v35  ;;  %1801 = vmatprep.mubr.bf16.mxu1 %v4033_v44  ;;  %v4018_v44 = vld [vmem:[#allocation3 + $0x108] ss:$16 sps:$4 sm:$0xff]  }
 0x1a9   :  { %2621 = vmatpush1.bf16.msra.mxu1 %v4129_v50 }
 0x1ab   :  { %1949 = vmatpush2.bf16.msra.mxu0 %v795_v54  ;;  %v4140_v54 = vld [vmem:[#allocation9 + $0x14] ss:$8 sps:$4 sm:$0xff]  }
 0x1ac   :  { %1950 = vmatprep.subr.bf16.mxu0 %v4283_v35  ;;  %2622 = vmatprep.subr.bf16.mxu1 %v4140_v54 }
 0x1ae   :  { %1722 = vmatmul.mubr.bf16.gmra.mxu0 %v3972_v55  ;;  %1802 = vmatmul.mubr.bf16.gmra.mxu1 %v4035_v39  ;;  %v4138_v55 = vld [vmem:[#allocation9 + $0x10] ss:$8 sps:$4 sm:$0xff]  }
 0x1af   :  { %1729 = vmatprep.mubr.bf16.mxu0 %v3973_v58  ;;  %1951 = vmatpush2.bf16.msra.mxu0 %v794_v57  ;;  %v4024_v39 = vld [vmem:[#allocation3 + $0x128] ss:$16 sps:$4 sm:$0xff]   ;;  %v4119_v58 = vld [vmem:[#allocation3 + $0x3a0] ss:$16 sps:$4 sm:$0xff]   ;;  %v4143_v57 = vld [vmem:[#allocation9 + $0x4] ss:$8 sps:$4 sm:$0xff]  }
 0x1b0   :  { %1952 = vmatprep.subr.bf16.mxu0 %v4283_v35  ;;  %1809 = vmatprep.mubr.bf16.mxu1 %v4039_v52  ;;  %v4032_v52 = vld [vmem:[#allocation3 + $0x14c] ss:$16 sps:$4 sm:$0xff]  }
 0x1b1   :  { %2623 = vmatpush1.bf16.msra.mxu1 %v4138_v55 }
 0x1b2   :  { %2624 = vmatprep.subr.bf16.mxu1 %v4143_v57 }
 0x1b3   :  { %1953 = vmatpush2.bf16.msra.mxu0 %v793_v23  ;;  %v4030_v23 = vld [vmem:[#allocation3 + $0x148] ss:$16 sps:$4 sm:$0xff]  }
 0x1b5   :  { %2625 = vmatpush1.bf16.msra.mxu1 %v4141_v60 }
 0x1b6   :  { %1730 = vmatmul.mubr.bf16.gmra.mxu0 %v3975_v29  ;;  %1810 = vmatmul.mubr.bf16.gmra.mxu1 %v4041_v61  ;;  %v4128_v29 = vld [vmem:[#allocation3 + $0x3c0] ss:$16 sps:$4 sm:$0xff]   ;;  %v4038_v61 = vld [vmem:[#allocation3 + $0x16c] ss:$16 sps:$4 sm:$0xff]  }
 0x1b7   :  { %1737 = vmatprep.mubr.bf16.mxu0 %v3976_v62  ;;  %1817 = vmatprep.mubr.bf16.mxu1 %v4048_v53  ;;  %v4135_v62 = vld [vmem:[#allocation3 + $0x3e4] ss:$16 sps:$4 sm:$0xff]   ;;  %v4036_v53 = vld [vmem:[#allocation3 + $0x168] ss:$16 sps:$4 sm:$0xff]  }
 0x1be   :  { %1738 = vmatmul.mubr.bf16.gmra.mxu0 %v3978_v56  ;;  %1818 = vmatmul.mubr.bf16.gmra.mxu1 %v4050_v32  ;;  %v4045_v56 = vld [vmem:[#allocation3 + $0x188] ss:$16 sps:$4 sm:$0xff]   ;;  %v4053_v32 = vld [vmem:[#allocation3 + $0x1ac] ss:$16 sps:$4 sm:$0xff]  }
 0x1bf   :  { %1954 = vmatprep.mubr.bf16.mxu0 %v3981_v2  ;;  %1825 = vmatprep.mubr.bf16.mxu1 %v4054_v3  ;;  %v4051_v2 = vld [vmem:[#allocation3 + $0x1a8] ss:$16 sps:$4 sm:$0xff]   ;;  %v4059_v3 = vld [vmem:[#allocation3 + $0x1cc] ss:$16 sps:$4 sm:$0xff]  }
 0x1c6   :  { %1955 = vmatmul.mubr.bf16.vlgmr.msra.gmra.mxu0 %v3979_v59  ;;  %1826 = vmatmul.mubr.bf16.gmra.mxu1 %v4056_v5  ;;  %v4057_v59 = vld [vmem:[#allocation3 + $0x1c8] ss:$16 sps:$4 sm:$0xff]   ;;  %v4068_v5 = vld [vmem:[#allocation3 + $0x1ec] ss:$16 sps:$4 sm:$0xff]  }
 0x1c7   :  { %1962 = vmatprep.mubr.bf16.mxu0 %v3982_v7  ;;  %1833 = vmatprep.mubr.bf16.mxu1 %v4063_v8 }
 0x1ce   :  { %1963 = vmatmul.mubr.bf16.gmra.mxu0 %v3984_v9  ;;  %1834 = vmatmul.mubr.bf16.gmra.mxu1 %v4065_v40 }
 0x1cf   :  { %1970 = vmatprep.mubr.bf16.mxu0 %v3987_v10  ;;  %1841 = vmatprep.mubr.bf16.mxu1 %v4069_v46  ;;  %v4066_v46 = vld [vmem:[#allocation3 + $0x1e8] ss:$16 sps:$4 sm:$0xff]  }
 0x1d6   :  { %1971 = vmatmul.mubr.bf16.gmra.mxu0 %v3985_v4  ;;  %1842 = vmatmul.mubr.bf16.gmra.mxu1 %v4071_v63 }
 0x1d7   :  { %1978 = vmatprep.mubr.bf16.mxu0 %v3990_v13  ;;  %1849 = vmatprep.mubr.bf16.mxu1 %v4075_v42 }
 0x1de   :  { %1979 = vmatmul.mubr.bf16.gmra.mxu0 %v3988_v14  ;;  %1850 = vmatmul.mubr.bf16.gmra.mxu1 %v4077_v48 }
 0x1df   :  { %1986 = vmatprep.mubr.bf16.mxu0 %v3996_v15  ;;  %1857 = vmatprep.mubr.bf16.mxu1 %v4084_v16  ;;  %v4072_v16 = vld [vmem:[#allocation3 + $0x208] ss:$16 sps:$4 sm:$0xff]  }
 0x1e6   :  { %1987 = vmatmul.mubr.bf16.gmra.mxu0 %v3994_v17  ;;  %1858 = vmatmul.mubr.bf16.gmra.mxu1 %v4086_v6  ;;  %v4083_v6 = vld [vmem:[#allocation3 + $0x22c] ss:$16 sps:$4 sm:$0xff]  }
 0x1e7   :  { %1994 = vmatprep.mubr.bf16.mxu0 %v4002_v19  ;;  %1865 = vmatprep.mubr.bf16.mxu1 %v4090_v20 }
 0x1ee   :  { %1995 = vmatmul.mubr.bf16.gmra.mxu0 %v4000_v21  ;;  %1866 = vmatmul.mubr.bf16.gmra.mxu1 %v4092_v22 }
 0x1ef   :  { %2002 = vmatprep.mubr.bf16.mxu0 %v4008_v24  ;;  %1873 = vmatprep.mubr.bf16.mxu1 %v4096_v26  ;;  %v4081_v26 = vld [vmem:[#allocation3 + $0x228] ss:$16 sps:$4 sm:$0xff]  }
 0x1f6   :  { %2003 = vmatmul.mubr.bf16.gmra.mxu0 %v4006_v27  ;;  %1874 = vmatmul.mubr.bf16.gmra.mxu1 %v4098_v28  ;;  %v4089_v28 = vld [vmem:[#allocation3 + $0x24c] ss:$16 sps:$4 sm:$0xff]  }
 0x1f7   :  { %2010 = vmatprep.mubr.bf16.mxu0 %v4014_v30  ;;  %1881 = vmatprep.mubr.bf16.mxu1 %v4105_v31 }
 0x1fe   :  { %2011 = vmatmul.mubr.bf16.gmra.mxu0 %v4012_v36  ;;  %1882 = vmatmul.mubr.bf16.gmra.mxu1 %v4107_v37 }
 0x1ff   :  { %2018 = vmatprep.mubr.bf16.mxu0 %v4020_v41  ;;  %1889 = vmatprep.mubr.bf16.mxu1 %v4111_v43  ;;  %v4087_v43 = vld [vmem:[#allocation3 + $0x248] ss:$16 sps:$4 sm:$0xff]  }
 0x206   :  { %2019 = vmatmul.mubr.bf16.gmra.mxu0 %v4018_v44  ;;  %1890 = vmatmul.mubr.bf16.gmra.mxu1 %v4113_v45  ;;  %v4095_v45 = vld [vmem:[#allocation3 + $0x26c] ss:$16 sps:$4 sm:$0xff]  }
 0x207   :  { %2026 = vmatprep.mubr.bf16.mxu0 %v4026_v49  ;;  %1897 = vmatprep.mubr.bf16.mxu1 %v4117_v38 }
 0x20e   :  { %2027 = vmatmul.mubr.bf16.gmra.mxu0 %v4024_v39  ;;  %1898 = vmatmul.mubr.bf16.gmra.mxu1 %v4119_v58  ;;  %v4093_v58 = vld [vmem:[#allocation3 + $0x268] ss:$16 sps:$4 sm:$0xff]  }
 0x20f   :  { %2034 = vmatprep.mubr.bf16.mxu0 %v4032_v52  ;;  %1905 = vmatprep.mubr.bf16.mxu1 %v4126_v51  ;;  %v4104_v51 = vld [vmem:[#allocation3 + $0x28c] ss:$16 sps:$4 sm:$0xff]  }
 0x216   :  { %2035 = vmatmul.mubr.bf16.gmra.mxu0 %v4030_v23  ;;  %1906 = vmatmul.mubr.bf16.gmra.mxu1 %v4128_v29 }
 0x217   :  { %2042 = vmatprep.mubr.bf16.mxu0 %v4038_v61  ;;  %1913 = vmatprep.mubr.bf16.mxu1 %v4135_v62 }
 0x21e   :  { %2043 = vmatmul.mubr.bf16.gmra.mxu0 %v4036_v53  ;;  %1914 = vmatmul.mubr.bf16.gmra.mxu1 %v4137_v25  ;;  %v4102_v25 = vld [vmem:[#allocation3 + $0x288] ss:$16 sps:$4 sm:$0xff]  }
 0x21f   :  { %2050 = vmatprep.mubr.bf16.mxu0 %v4047_v0  ;;  %2642 = vmatprep.mubr.bf16.mxu1 %v4283_v35 }
 0x226   :  { %2051 = vmatmul.mubr.bf16.gmra.mxu0 %v4045_v56  ;;  %v4110_v56 = vld [vmem:[#allocation3 + $0x2ac] ss:$16 sps:$4 sm:$0xff]  }
 0x227   :  { %2058 = vmatprep.mubr.bf16.mxu0 %v4053_v32 }
 0x22e   :  { %2059 = vmatmul.mubr.bf16.gmra.mxu0 %v4051_v2 }
 0x22f   :  { %2066 = vmatprep.mubr.bf16.mxu0 %v4059_v3 }
 0x236   :  { %v4540_v7 = vpop.f32.mrf.mxu0  ;;  %2067 = vmatmul.mubr.bf16.gmra.mxu0 %v4057_v59  ;;  %v4542_v8 = vpop.f32.mrf.mxu1 }
 0x237   :  { %2074 = vmatprep.mubr.bf16.mxu0 %v4068_v5 }
 0x238   :  { %v1669_v9 = vpop.f32.mrf.mxu0  ;;  %v1749_v40 = vpop.f32.mrf.mxu1 }
 0x23a   :  { %v4544_v10 = vpop.f32.mrf.mxu0  ;;  %v4546_v11 = vpop.f32.mrf.mxu1 }
 0x23c   :  { %v1672_v4 = vpop.f32.mrf.mxu0  ;;  %v1752_v63 = vpop.f32.mrf.mxu1 }
 0x23d   :  { %v4116_v4 = vld [vmem:[#allocation3 + $0x2cc] ss:$16 sps:$4 sm:$0xff]  }
 0x23e   :  { %v4548_v13 = vpop.f32.mrf.mxu0  ;;  %2075 = vmatmul.mubr.bf16.gmra.mxu0 %v4066_v46  ;;  %v4550_v42 = vpop.f32.mrf.mxu1  ;;  %v4108_v46 = vld [vmem:[#allocation3 + $0x2a8] ss:$16 sps:$4 sm:$0xff]  }
 0x23f   :  { %2082 = vmatprep.mubr.bf16.mxu0 %v4074_v12 }
 0x240   :  { %v1677_v14 = vpop.f32.mrf.mxu0  ;;  %v1757_v48 = vpop.f32.mrf.mxu1 }
 0x242   :  { %v4552_v15 = vpop.f32.mrf.mxu0  ;;  %v4554_v17 = vpop.f32.mrf.mxu1 }
 0x244   :  { %v1680_v18 = vpop.f32.mrf.mxu0  ;;  %v1760_v1 = vpop.f32.mrf.mxu1 }
 0x246   :  { %v4556_v19 = vpop.f32.mrf.mxu0  ;;  %2083 = vmatmul.mubr.bf16.gmra.mxu0 %v4072_v16  ;;  %v4558_v20 = vpop.f32.mrf.mxu1 }
 0x247   :  { %2090 = vmatprep.mubr.bf16.mxu0 %v4083_v6 }
 0x248   :  { %v1685_v21 = vpop.f32.mrf.mxu0  ;;  %v1765_v22 = vpop.f32.mrf.mxu1 }
 0x249   :  { %v4114_v21 = vld [vmem:[#allocation3 + $0x2c8] ss:$16 sps:$4 sm:$0xff]  }
 0x24a   :  { %v4560_v24 = vpop.f32.mrf.mxu0  ;;  %v4562_v27 = vpop.f32.mrf.mxu1 }
 0x24c   :  { %v1688_v30 = vpop.f32.mrf.mxu0  ;;  %v1768_v31 = vpop.f32.mrf.mxu1 }
 0x24e   :  { %v4564_v33 = vpop.f32.mrf.mxu0  ;;  %2091 = vmatmul.mubr.bf16.gmra.mxu0 %v4081_v26  ;;  %v4566_v34 = vpop.f32.mrf.mxu1  ;;  %v4125_v26 = vld [vmem:[#allocation3 + $0x2ec] ss:$16 sps:$4 sm:$0xff]  }
 0x24f   :  { %2098 = vmatprep.mubr.bf16.mxu0 %v4089_v28 }
 0x250   :  { %v1693_v36 = vpop.f32.mrf.mxu0  ;;  %v1773_v37 = vpop.f32.mrf.mxu1 }
 0x252   :  { %v4568_v41 = vpop.f32.mrf.mxu0  ;;  %v4570_v44 = vpop.f32.mrf.mxu1 }
 0x254   :  { %v1696_v49 = vpop.f32.mrf.mxu0  ;;  %v1776_v38 = vpop.f32.mrf.mxu1 }
 0x255   :  { %v4123_v49 = vld [vmem:[#allocation3 + $0x2e8] ss:$16 sps:$4 sm:$0xff]  }
 0x256   :  { %v4572_v47 = vpop.f32.mrf.mxu0  ;;  %2099 = vmatmul.mubr.bf16.gmra.mxu0 %v4087_v43  ;;  %v4574_v50 = vpop.f32.mrf.mxu1 }
 0x257   :  { %2106 = vmatprep.mubr.bf16.mxu0 %v4095_v45 }
 0x258   :  { %v1701_v54 = vpop.f32.mrf.mxu0  ;;  %v1781_v55 = vpop.f32.mrf.mxu1 }
 0x259   :  { %v4134_v54 = vld [vmem:[#allocation3 + $0x30c] ss:$16 sps:$4 sm:$0xff]  }
 0x25a   :  { %v4576_v39 = vpop.f32.mrf.mxu0  ;;  %v4578_v52 = vpop.f32.mrf.mxu1 }
 0x25c   :  { %v1704_v57 = vpop.f32.mrf.mxu0  ;;  %v1784_v60 = vpop.f32.mrf.mxu1 }
 0x25e   :  { %v4580_v23 = vpop.f32.mrf.mxu0  ;;  %2107 = vmatmul.mubr.bf16.gmra.mxu0 %v4093_v58  ;;  %v4582_v29 = vpop.f32.mrf.mxu1 }
 0x25f   :  { %2114 = vmatprep.mubr.bf16.mxu0 %v4104_v51 }
 0x260   :  { %v1709_v61 = vpop.f32.mrf.mxu0  ;;  %v1789_v62 = vpop.f32.mrf.mxu1 }
 0x262   :  { %v4584_v53 = vpop.f32.mrf.mxu0  ;;  %v4586_v0 = vpop.f32.mrf.mxu1 }
 0x264   :  { %v1712_v32 = vpop.f32.mrf.mxu0  ;;  %v1792_v2 = vpop.f32.mrf.mxu1 }
 0x265   :  { %v4146_v32 = vld [vmem:[#allocation3 + $0x32c] ss:$16 sps:$4 sm:$0xff]  }
 0x266   :  { %v4588_v3 = vpop.f32.mrf.mxu0  ;;  %2115 = vmatmul.mubr.bf16.gmra.mxu0 %v4102_v25  ;;  %v4590_v59 = vpop.f32.mrf.mxu1  ;;  %v4132_v25 = vld [vmem:[#allocation3 + $0x308] ss:$16 sps:$4 sm:$0xff]  }
 0x267   :  { %2122 = vmatprep.mubr.bf16.mxu0 %v4110_v56 }
 0x268   :  { %v1717_v5 = vpop.f32.mrf.mxu0  ;;  %v1797_v9 = vpop.f32.mrf.mxu1 }
 0x26a   :  { %v4592_v40 = vpop.f32.mrf.mxu0  ;;  %v4594_v12 = vpop.f32.mrf.mxu1 }
 0x26c   :  { %v1720_v63 = vpop.f32.mrf.mxu0  ;;  %v1800_v14 = vpop.f32.mrf.mxu1 }
 0x26e   :  { %v4596_v48 = vpop.f32.mrf.mxu0  ;;  %2123 = vmatmul.mubr.bf16.gmra.mxu0 %v4108_v46  ;;  %v4598_v16 = vpop.f32.mrf.mxu1 }
 0x26f   :  { %2130 = vmatprep.mubr.bf16.mxu0 %v4116_v4 }
 0x270   :  { %v1725_v6 = vpop.f32.mrf.mxu0  ;;  %v1805_v18 = vpop.f32.mrf.mxu1 }
 0x271   :  { %v4144_v18 = vld [vmem:[#allocation3 + $0x328] ss:$16 sps:$4 sm:$0xff]  }
 0x272   :  { %v4600_v1 = vpop.f32.mrf.mxu0  ;;  %v4602_v22 = vpop.f32.mrf.mxu1 }
 0x274   :  { %v1728_v28 = vpop.f32.mrf.mxu0  ;;  %v1808_v30 = vpop.f32.mrf.mxu1 }
 0x275   :  { %v4149_v28 = vld [vmem:[#allocation3 + $0x34c] ss:$16 sps:$4 sm:$0xff]  }
 0x276   :  { %v4604_v31 = vpop.f32.mrf.mxu0  ;;  %2131 = vmatmul.mubr.bf16.gmra.mxu0 %v4114_v21  ;;  %v4606_v36 = vpop.f32.mrf.mxu1 }
 0x277   :  { %2138 = vmatprep.mubr.bf16.mxu0 %v4125_v26 }
 0x278   :  { %v1733_v37 = vpop.f32.mrf.mxu0  ;;  %v1813_v43 = vpop.f32.mrf.mxu1 }
 0x27a   :  { %v4608_v45 = vpop.f32.mrf.mxu0  ;;  %v4610_v38 = vpop.f32.mrf.mxu1 }
 0x27c   :  { %v1736_v55 = vpop.f32.mrf.mxu0  ;;  %v1816_v58 = vpop.f32.mrf.mxu1 }
 0x27e   :  { %v4612_v51 = vpop.f32.mrf.mxu0  ;;  %2139 = vmatmul.mubr.bf16.gmra.mxu0 %v4123_v49  ;;  %v4614_v57 = vpop.f32.mrf.mxu1 }
 0x27f   :  { %2146 = vmatprep.mubr.bf16.mxu0 %v4134_v54 }
 0x280   :  { %v1741_v60 = vpop.f32.mrf.mxu0  ;;  %v1821_v61 = vpop.f32.mrf.mxu1 }
 0x282   :  { %v4616_v62 = vpop.f32.mrf.mxu0  ;;  %v4618_v56 = vpop.f32.mrf.mxu1 }
 0x284   :  { %v1744_v2 = vpop.f32.mrf.mxu0  ;;  %v1824_v5 = vpop.f32.mrf.mxu1 }
 0x285   :  { %v4152_v5 = vld [vmem:[#allocation3 + $0x36c] ss:$16 sps:$4 sm:$0xff]  }
 0x286   :  { %v1956_v9 = vpop.f32.mrf.mxu0  ;;  %2147 = vmatmul.mubr.bf16.gmra.mxu0 %v4132_v25  ;;  %v4620_v46 = vpop.f32.mrf.mxu1 }
 0x287   :  { %2154 = vmatprep.mubr.bf16.mxu0 %v4146_v32  ;;  %v1957_v14 = vadd.f32 %v1956_v9, %v4540_v7  ;;  %v4147_v32 = vld [vmem:[#allocation3 + $0x348] ss:$16 sps:$4 sm:$0xff]  }
 0x288   :  { %v1958_v4 = vpop.f32.mrf.mxu0  ;;  %v1829_v63 = vpop.f32.mrf.mxu1 }
 0x289   :  { %v2406_v43 = vmax.f32 %v1957_v14, 0.0 }
 0x28a   :  { %v1959_v6 = vpop.f32.mrf.mxu0  ;;  %v4623_v21 = vpop.f32.mrf.mxu1 }
 0x28b   :  { %v1960_v26 = vadd.f32 %v1959_v6, %v4544_v10 }
 0x28c   :  { %v1961_v30 = vpop.f32.mrf.mxu0  ;;  %v1832_v37 = vpop.f32.mrf.mxu1 }
 0x28d   :  { %v2407_v49 = vmax.f32 %v1960_v26, 0.0 }
 0x28e   :  { %v1964_v54 = vpop.f32.mrf.mxu0  ;;  %2155 = vmatmul.mubr.bf16.gmra.mxu0 %v4144_v18  ;;  %v4626_v55 = vpop.f32.mrf.mxu1 }
 0x28f   :  { %v2470_v58 = vpack.c.bf16 %v2407_v49, %v2406_v43  ;;  %2162 = vmatprep.mubr.bf16.mxu0 %v4149_v28  ;;  %v1965_v7 = vadd.f32 %v1964_v54, %v4548_v13  ;;  %v4150_v43 = vld [vmem:[#allocation3 + $0x368] ss:$16 sps:$4 sm:$0xff]   ;;  %v4155_v54 = vld [vmem:[#allocation3 + $0x38c] ss:$16 sps:$4 sm:$0xff]  }
 0x290   :  { %v1966_v60 = vpop.f32.mrf.mxu0  ;;  %v1837_v61 = vpop.f32.mrf.mxu1 }
 0x291   :  { %2643 = vmatmul.mubr.bf16.vlgmr.msra.gmra.mxu1 %v2470_v58  ;;  %v2408_v63 = vmax.f32 %v1965_v7, 0.0 }
 0x292   :  { %v1967_v25 = vpop.f32.mrf.mxu0  ;;  %2652 = vmatprep.mubr.bf16.mxu1 %v4283_v35  ;;  %v4630_v10 = vpop.f32.mrf.mxu1 }
 0x293   :  { %v1968_v2 = vadd.f32 %v1967_v25, %v4552_v15 }
 0x294   :  { %v1969_v9 = vpop.f32.mrf.mxu0  ;;  %v1840_v4 = vpop.f32.mrf.mxu1 }
 0x295   :  { %v2409_v14 = vmax.f32 %v1968_v2, 0.0 }
 0x296   :  { %v1972_v6 = vpop.f32.mrf.mxu0  ;;  %2163 = vmatmul.mubr.bf16.gmra.mxu0 %v4147_v32  ;;  %v4633_v18 = vpop.f32.mrf.mxu1 }
 0x297   :  { %v2471_v26 = vpack.c.bf16 %v2409_v14, %v2408_v63  ;;  %2170 = vmatprep.mubr.bf16.mxu0 %v4152_v5  ;;  %v1973_v30 = vadd.f32 %v1972_v6, %v4556_v19  ;;  %v4153_v63 = vld [vmem:[#allocation3 + $0x388] ss:$16 sps:$4 sm:$0xff]   ;;  %v4158_v6 = vld [vmem:[#allocation3 + $0x3ac] ss:$16 sps:$4 sm:$0xff]  }
 0x298   :  { %v1974_v13 = vpop.f32.mrf.mxu0  ;;  %v1845_v28 = vpop.f32.mrf.mxu1 }
 0x299   :  { %2653 = vmatmul.mubr.bf16.gmra.mxu1 %v2471_v26  ;;  %v2410_v61 = vmax.f32 %v1973_v30, 0.0 }
 0x29a   :  { %v1975_v37 = vpop.f32.mrf.mxu0  ;;  %2662 = vmatprep.mubr.bf16.mxu1 %v4283_v35  ;;  %v4637_v15 = vpop.f32.mrf.mxu1 }
 0x29b   :  { %v1976_v49 = vadd.f32 %v1975_v37, %v4560_v24 }
 0x29c   :  { %v1977_v58 = vpop.f32.mrf.mxu0  ;;  %v1848_v60 = vpop.f32.mrf.mxu1 }
 0x29d   :  { %v2411_v7 = vmax.f32 %v1976_v49, 0.0 }
 0x29e   :  { %v1980_v25 = vpop.f32.mrf.mxu0  ;;  %2171 = vmatmul.mubr.bf16.gmra.mxu0 %v4150_v43  ;;  %v4640_v32 = vpop.f32.mrf.mxu1 }
 0x29f   :  { %v2472_v2 = vpack.c.bf16 %v2411_v7, %v2410_v61  ;;  %2178 = vmatprep.mubr.bf16.mxu0 %v4155_v54  ;;  %v1981_v9 = vadd.f32 %v1980_v25, %v4564_v33  ;;  %v4156_v61 = vld [vmem:[#allocation3 + $0x3a8] ss:$16 sps:$4 sm:$0xff]   ;;  %v4161_v25 = vld [vmem:[#allocation3 + $0x3cc] ss:$16 sps:$4 sm:$0xff]  }
 0x2a0   :  { %v1982_v19 = vpop.f32.mrf.mxu0  ;;  %v1853_v5 = vpop.f32.mrf.mxu1 }
 0x2a1   :  { %2663 = vmatmul.mubr.bf16.gmra.mxu1 %v2472_v2  ;;  %v2412_v28 = vmax.f32 %v1981_v9, 0.0 }
 0x2a2   :  { %v1983_v4 = vpop.f32.mrf.mxu0  ;;  %2672 = vmatprep.mubr.bf16.mxu1 %v4283_v35  ;;  %v4644_v24 = vpop.f32.mrf.mxu1 }
 0x2a3   :  { %v1984_v14 = vadd.f32 %v1983_v4, %v4568_v41 }
 0x2a4   :  { %v1985_v26 = vpop.f32.mrf.mxu0  ;;  %v1856_v13 = vpop.f32.mrf.mxu1 }
 0x2a5   :  { %v2413_v30 = vmax.f32 %v1984_v14, 0.0 }
 0x2a6   :  { %v1988_v37 = vpop.f32.mrf.mxu0  ;;  %2179 = vmatmul.mubr.bf16.gmra.mxu0 %v4153_v63  ;;  %v4647_v43 = vpop.f32.mrf.mxu1 }
 0x2a7   :  { %v2473_v49 = vpack.c.bf16 %v2413_v30, %v2412_v28  ;;  %2186 = vmatprep.mubr.bf16.mxu0 %v4158_v6  ;;  %v1989_v58 = vadd.f32 %v1988_v37, %v4572_v47  ;;  %v4159_v28 = vld [vmem:[#allocation3 + $0x3c8] ss:$16 sps:$4 sm:$0xff]   ;;  %v4164_v37 = vld [vmem:[#allocation3 + $0x3ec] ss:$16 sps:$4 sm:$0xff]  }
 0x2a8   :  { %v1990_v33 = vpop.f32.mrf.mxu0  ;;  %v1861_v54 = vpop.f32.mrf.mxu1 }
 0x2a9   :  { %2673 = vmatmul.mubr.bf16.gmra.mxu1 %v2473_v49  ;;  %v2414_v5 = vmax.f32 %v1989_v58, 0.0 }
 0x2aa   :  { %v1991_v60 = vpop.f32.mrf.mxu0  ;;  %2682 = vmatprep.mubr.bf16.mxu1 %v4283_v35  ;;  %v4651_v41 = vpop.f32.mrf.mxu1 }
 0x2ab   :  { %v1992_v7 = vadd.f32 %v1991_v60, %v4576_v39 }
 0x2ac   :  { %v1993_v2 = vpop.f32.mrf.mxu0  ;;  %v1864_v19 = vpop.f32.mrf.mxu1 }
 0x2ad   :  { %v2415_v9 = vmax.f32 %v1992_v7, 0.0 }
 0x2ae   :  { %v1996_v4 = vpop.f32.mrf.mxu0  ;;  %2187 = vmatmul.mubr.bf16.gmra.mxu0 %v4156_v61  ;;  %v4654_v63 = vpop.f32.mrf.mxu1 }
 0x2af   :  { %v2474_v14 = vpack.c.bf16 %v2415_v9, %v2414_v5  ;;  %2194 = vmatprep.mubr.bf16.mxu0 %v4161_v25  ;;  %v1997_v26 = vadd.f32 %v1996_v4, %v4580_v23  ;;  %v4162_v5 = vld [vmem:[#allocation3 + $0x3e8] ss:$16 sps:$4 sm:$0xff]  }
 0x2b0   :  { %v1998_v47 = vpop.f32.mrf.mxu0  ;;  %v1869_v6 = vpop.f32.mrf.mxu1 }
 0x2b1   :  { %2683 = vmatmul.mubr.bf16.gmra.mxu1 %v2474_v14  ;;  %v2416_v54 = vmax.f32 %v1997_v26, 0.0 }
 0x2b2   :  { %v1999_v13 = vpop.f32.mrf.mxu0  ;;  %2692 = vmatprep.mubr.bf16.mxu1 %v4283_v35  ;;  %v4658_v39 = vpop.f32.mrf.mxu1 }
 0x2b3   :  { %v2000_v30 = vadd.f32 %v1999_v13, %v4584_v53 }
 0x2b4   :  { %v2001_v49 = vpop.f32.mrf.mxu0  ;;  %v1872_v33 = vpop.f32.mrf.mxu1 }
 0x2b5   :  { %v2417_v58 = vmax.f32 %v2000_v30, 0.0 }
 0x2b6   :  { %v2004_v60 = vpop.f32.mrf.mxu0  ;;  %2195 = vmatmul.mubr.bf16.gmra.mxu0 %v4159_v28  ;;  %v4661_v61 = vpop.f32.mrf.mxu1 }
 0x2b7   :  { %v2475_v7 = vpack.c.bf16 %v2417_v58, %v2416_v54  ;;  %2202 = vmatprep.mubr.bf16.mxu0 %v4164_v37  ;;  %v2005_v2 = vadd.f32 %v2004_v60, %v4588_v3 }
 0x2b8   :  { %v2006_v23 = vpop.f32.mrf.mxu0  ;;  %v1877_v25 = vpop.f32.mrf.mxu1 }
 0x2b9   :  { %2693 = vmatmul.mubr.bf16.gmra.mxu1 %v2475_v7  ;;  %v2418_v47 = vmax.f32 %v2005_v2, 0.0 }
 0x2ba   :  { %v2007_v19 = vpop.f32.mrf.mxu0  ;;  %2702 = vmatprep.mubr.bf16.mxu1 %v4283_v35  ;;  %v4665_v53 = vpop.f32.mrf.mxu1 }
 0x2bb   :  { %v2008_v9 = vadd.f32 %v2007_v19, %v4592_v40 }
 0x2bc   :  { %v2009_v4 = vpop.f32.mrf.mxu0  ;;  %v1880_v14 = vpop.f32.mrf.mxu1 }
 0x2bd   :  { %v2419_v6 = vmax.f32 %v2008_v9, 0.0 }
 0x2be   :  { %v2012_v26 = vpop.f32.mrf.mxu0  ;;  %2203 = vmatmul.mubr.bf16.gmra.mxu0 %v4162_v5  ;;  %v4668_v13 = vpop.f32.mrf.mxu1 }
 0x2bf   :  { %v2476_v28 = vpack.c.bf16 %v2419_v6, %v2418_v47  ;;  %v2013_v37 = vadd.f32 %v2012_v26, %v4596_v48 }
 0x2c0   :  { %v2014_v30 = vpop.f32.mrf.mxu0  ;;  %v1885_v3 = vpop.f32.mrf.mxu1 }
 0x2c1   :  { %2703 = vmatmul.mubr.bf16.gmra.mxu1 %v2476_v28  ;;  %v2420_v60 = vmax.f32 %v2013_v37, 0.0 }
 0x2c2   :  { %v2015_v49 = vpop.f32.mrf.mxu0  ;;  %2712 = vmatprep.mubr.bf16.mxu1 %v4283_v35  ;;  %v4672_v33 = vpop.f32.mrf.mxu1 }
 0x2c3   :  { %v2016_v40 = vadd.f32 %v2015_v49, %v4600_v1 }
 0x2c4   :  { %v2017_v54 = vpop.f32.mrf.mxu0  ;;  %v1888_v58 = vpop.f32.mrf.mxu1 }
 0x2c5   :  { %v2421_v7 = vmax.f32 %v2016_v40, 0.0 }
 0x2c6   :  { %v2020_v23 = vpop.f32.mrf.mxu0  ;;  %v4675_v25 = vpop.f32.mrf.mxu1 }
 0x2c7   :  { %v2477_v2 = vpack.c.bf16 %v2421_v7, %v2420_v60  ;;  %v2021_v48 = vadd.f32 %v2020_v23, %v4604_v31 }
 0x2c8   :  { %v2022_v19 = vpop.f32.mrf.mxu0  ;;  %v1893_v5 = vpop.f32.mrf.mxu1 }
 0x2c9   :  { %2713 = vmatmul.mubr.bf16.gmra.mxu1 %v2477_v2  ;;  %v2422_v6 = vmax.f32 %v2021_v48, 0.0 }
 0x2ca   :  { %v2023_v9 = vpop.f32.mrf.mxu0  ;;  %2722 = vmatprep.mubr.bf16.mxu1 %v4283_v35  ;;  %v4679_v4 = vpop.f32.mrf.mxu1 }
 0x2cb   :  { %v2024_v1 = vadd.f32 %v2023_v9, %v4608_v45 }
 0x2cc   :  { %v2025_v14 = vpop.f32.mrf.mxu0  ;;  %v1896_v47 = vpop.f32.mrf.mxu1 }
 0x2cd   :  { %v2423_v26 = vmax.f32 %v2024_v1, 0.0 }
 0x2ce   :  { %v2028_v28 = vpop.f32.mrf.mxu0  ;;  %v4682_v30 = vpop.f32.mrf.mxu1 }
 0x2cf   :  { %v2478_v3 = vpack.c.bf16 %v2423_v26, %v2422_v6  ;;  %v2029_v31 = vadd.f32 %v2028_v28, %v4612_v51 }
 0x2d0   :  { %v2030_v37 = vpop.f32.mrf.mxu0  ;;  %v1901_v49 = vpop.f32.mrf.mxu1 }
 0x2d1   :  { %2723 = vmatmul.mubr.bf16.gmra.mxu1 %v2478_v3  ;;  %v2424_v7 = vmax.f32 %v2029_v31, 0.0 }
 0x2d2   :  { %v2031_v40 = vpop.f32.mrf.mxu0  ;;  %2732 = vmatprep.mubr.bf16.mxu1 %v4283_v35  ;;  %v4686_v54 = vpop.f32.mrf.mxu1 }
 0x2d3   :  { %v2032_v45 = vadd.f32 %v2031_v40, %v4616_v62 }
 0x2d4   :  { %v2033_v58 = vpop.f32.mrf.mxu0  ;;  %v1904_v60 = vpop.f32.mrf.mxu1 }
 0x2d5   :  { %v2425_v23 = vmax.f32 %v2032_v45, 0.0 }
 0x2d6   :  { %v2036_v2 = vpop.f32.mrf.mxu0  ;;  %v4689_v19 = vpop.f32.mrf.mxu1 }
 0x2d7   :  { %v2479_v5 = vpack.c.bf16 %v2425_v23, %v2424_v7  ;;  %v2037_v51 = vadd.f32 %v2036_v2, %v4542_v8 }
 0x2d8   :  { %v2038_v48 = vpop.f32.mrf.mxu0  ;;  %v1909_v9 = vpop.f32.mrf.mxu1 }
 0x2d9   :  { %2733 = vmatmul.mubr.bf16.gmra.mxu1 %v2479_v5  ;;  %v2426_v26 = vmax.f32 %v2037_v51, 0.0 }
 0x2da   :  { %v2039_v1 = vpop.f32.mrf.mxu0  ;;  %2742 = vmatprep.mubr.bf16.mxu1 %v4283_v35  ;;  %v4693_v14 = vpop.f32.mrf.mxu1 }
 0x2db   :  { %v2040_v62 = vadd.f32 %v2039_v1, %v4546_v11 }
 0x2dc   :  { %v2041_v47 = vpop.f32.mrf.mxu0  ;;  %v1912_v6 = vpop.f32.mrf.mxu1 }
 0x2dd   :  { %v2427_v28 = vmax.f32 %v2040_v62, 0.0 }
 0x2de   :  { %v2044_v3 = vpop.f32.mrf.mxu0  ;;  %v4696_v37 = vpop.f32.mrf.mxu1 }
 0x2df   :  { %v2480_v49 = vpack.c.bf16 %v2427_v28, %v2426_v26  ;;  %v2045_v8 = vadd.f32 %v2044_v3, %v4550_v42 }
 0x2e0   :  { %v2046_v31 = vpop.f32.mrf.mxu0  ;;  %v1917_v40 = vpop.f32.mrf.mxu1 }
 0x2e1   :  { %2743 = vmatmul.mubr.bf16.gmra.mxu1 %v2480_v49  ;;  %v2428_v23 = vmax.f32 %v2045_v8, 0.0 }
 0x2e2   :  { %v2047_v45 = vpop.f32.mrf.mxu0  ;;  %2752 = vmatprep.mubr.bf16.mxu1 %v4283_v35  ;;  %v4700_v58 = vpop.f32.mrf.mxu1 }
 0x2e3   :  { %v2048_v11 = vadd.f32 %v2047_v45, %v4554_v17 }
 0x2e4   :  { %v2049_v60 = vpop.f32.mrf.mxu0  ;;  %v1920_v7 = vpop.f32.mrf.mxu1 }
 0x2e5   :  { %v2429_v2 = vmax.f32 %v2048_v11, 0.0 }
 0x2e6   :  { %v2052_v5 = vpop.f32.mrf.mxu0 }
 0x2e7   :  { %v2481_v48 = vpack.c.bf16 %v2429_v2, %v2428_v23  ;;  %v2053_v51 = vadd.f32 %v2052_v5, %v4558_v20 }
 0x2e8   :  { %v2054_v9 = vpop.f32.mrf.mxu0 }
 0x2e9   :  { %2753 = vmatmul.mubr.bf16.gmra.mxu1 %v2481_v48  ;;  %v2430_v47 = vmax.f32 %v2053_v51, 0.0 }
 0x2ea   :  { %v2055_v1 = vpop.f32.mrf.mxu0  ;;  %2762 = vmatprep.mubr.bf16.mxu1 %v4283_v35 }
 0x2eb   :  { %v2056_v42 = vadd.f32 %v2055_v1, %v4562_v27 }
 0x2ec   :  { %v2057_v62 = vpop.f32.mrf.mxu0 }
 0x2ed   :  { %v2431_v6 = vmax.f32 %v2056_v42, 0.0 }
 0x2ee   :  { %v2060_v26 = vpop.f32.mrf.mxu0 }
 0x2ef   :  { %v2482_v17 = vpack.c.bf16 %v2431_v6, %v2430_v47  ;;  %v2061_v3 = vadd.f32 %v2060_v26, %v4566_v34 }
 0x2f0   :  { %v2062_v28 = vpop.f32.mrf.mxu0 }
 0x2f1   :  { %2763 = vmatmul.mubr.bf16.gmra.mxu1 %v2482_v17  ;;  %v2432_v40 = vmax.f32 %v2061_v3, 0.0 }
 0x2f2   :  { %v2063_v49 = vpop.f32.mrf.mxu0  ;;  %2772 = vmatprep.mubr.bf16.mxu1 %v4283_v35 }
 0x2f3   :  { %v2064_v20 = vadd.f32 %v2063_v49, %v4570_v44 }
 0x2f4   :  { %v2065_v31 = vpop.f32.mrf.mxu0 }
 0x2f5   :  { %v2433_v8 = vmax.f32 %v2064_v20, 0.0 }
 0x2f6   :  { %v2068_v45 = vpop.f32.mrf.mxu0 }
 0x2f7   :  { %v2483_v11 = vpack.c.bf16 %v2433_v8, %v2432_v40  ;;  %v2069_v60 = vadd.f32 %v2068_v45, %v4574_v50 }
 0x2f8   :  { %v2070_v27 = vpop.f32.mrf.mxu0 }
 0x2f9   :  { %2773 = vmatmul.mubr.bf16.gmra.mxu1 %v2483_v11  ;;  %v2434_v2 = vmax.f32 %v2069_v60, 0.0 }
 0x2fa   :  { %v2071_v7 = vpop.f32.mrf.mxu0  ;;  %2782 = vmatprep.mubr.bf16.mxu1 %v4283_v35 }
 0x2fb   :  { %v2072_v34 = vadd.f32 %v2071_v7, %v4578_v52 }
 0x2fc   :  { %v2073_v23 = vpop.f32.mrf.mxu0 }
 0x2fd   :  { %v2435_v5 = vmax.f32 %v2072_v34, 0.0 }
 0x2fe   :  { %v2076_v48 = vpop.f32.mrf.mxu0 }
 0x2ff   :  { %v2484_v9 = vpack.c.bf16 %v2435_v5, %v2434_v2  ;;  %v2077_v51 = vadd.f32 %v2076_v48, %v4582_v29 }
 0x300   :  { %v2078_v44 = vpop.f32.mrf.mxu0 }
 0x301   :  { %2783 = vmatmul.mubr.bf16.gmra.mxu1 %v2484_v9  ;;  %v2436_v62 = vmax.f32 %v2077_v51, 0.0 }
 0x302   :  { %v2079_v1 = vpop.f32.mrf.mxu0  ;;  %2792 = vmatprep.mubr.bf16.mxu1 %v4283_v35 }
 0x303   :  { %v2080_v50 = vadd.f32 %v2079_v1, %v4586_v0 }
 0x304   :  { %v2081_v42 = vpop.f32.mrf.mxu0 }
 0x305   :  { %v2437_v47 = vmax.f32 %v2080_v50, 0.0 }
 0x306   :  { %v2084_v6 = vpop.f32.mrf.mxu0 }
 0x307   :  { %v2485_v26 = vpack.c.bf16 %v2437_v47, %v2436_v62  ;;  %v2085_v17 = vadd.f32 %v2084_v6, %v4590_v59 }
 0x308   :  { %v2086_v52 = vpop.f32.mrf.mxu0 }
 0x309   :  { %2793 = vmatmul.mubr.bf16.gmra.mxu1 %v2485_v26  ;;  %v2438_v49 = vmax.f32 %v2085_v17, 0.0 }
 0x30a   :  { %v2087_v28 = vpop.f32.mrf.mxu0  ;;  %2802 = vmatprep.mubr.bf16.mxu1 %v4283_v35 }
 0x30b   :  { %v2088_v29 = vadd.f32 %v2087_v28, %v4594_v12 }
 0x30c   :  { %v2089_v3 = vpop.f32.mrf.mxu0 }
 0x30d   :  { %v2439_v20 = vmax.f32 %v2088_v29, 0.0 }
 0x30e   :  { %v2092_v31 = vpop.f32.mrf.mxu0 }
 0x30f   :  { %v2486_v40 = vpack.c.bf16 %v2439_v20, %v2438_v49  ;;  %v2093_v8 = vadd.f32 %v2092_v31, %v4598_v16 }
 0x310   :  { %v2094_v0 = vpop.f32.mrf.mxu0 }
 0x311   :  { %2803 = vmatmul.mubr.bf16.gmra.mxu1 %v2486_v40  ;;  %v2440_v27 = vmax.f32 %v2093_v8, 0.0 }
 0x312   :  { %v2095_v45 = vpop.f32.mrf.mxu0  ;;  %2812 = vmatprep.mubr.bf16.mxu1 %v4283_v35 }
 0x313   :  { %v2096_v59 = vadd.f32 %v2095_v45, %v4602_v22 }
 0x314   :  { %v2097_v11 = vpop.f32.mrf.mxu0 }
 0x315   :  { %v2441_v60 = vmax.f32 %v2096_v59, 0.0 }
 0x316   :  { %v2100_v7 = vpop.f32.mrf.mxu0 }
 0x317   :  { %v2487_v34 = vpack.c.bf16 %v2441_v60, %v2440_v27  ;;  %v2101_v23 = vadd.f32 %v2100_v7, %v4606_v36 }
 0x318   :  { %v2102_v12 = vpop.f32.mrf.mxu0 }
 0x319   :  { %2813 = vmatmul.mubr.bf16.gmra.mxu1 %v2487_v34  ;;  %v2442_v48 = vmax.f32 %v2101_v23, 0.0 }
 0x31a   :  { %v2103_v2 = vpop.f32.mrf.mxu0  ;;  %2822 = vmatprep.mubr.bf16.mxu1 %v4283_v35 }
 0x31b   :  { %v2104_v16 = vadd.f32 %v2103_v2, %v4610_v38 }
 0x31c   :  { %v2105_v5 = vpop.f32.mrf.mxu0 }
 0x31d   :  { %v2443_v9 = vmax.f32 %v2104_v16, 0.0 }
 0x31e   :  { %v2108_v44 = vpop.f32.mrf.mxu0 }
 0x31f   :  { %v2488_v51 = vpack.c.bf16 %v2443_v9, %v2442_v48  ;;  %v2109_v1 = vadd.f32 %v2108_v44, %v4614_v57  ;;  %v2520_v9 = vlaneseq }
 0x320   :  { %v2110_v22 = vpop.f32.mrf.mxu0 }
 0x321   :  { %2823 = vmatmul.mubr.bf16.gmra.mxu1 %v2488_v51  ;;  %v2444_v62 = vmax.f32 %v2109_v1, 0.0 }
 0x322   :  { %v2111_v50 = vpop.f32.mrf.mxu0  ;;  %2832 = vmatprep.mubr.bf16.mxu1 %v4283_v35 }
 0x323   :  { %v2112_v36 = vadd.f32 %v2111_v50, %v4618_v56  ;;  %v2521_v50 = vshrl.u32 %v2520_v9, 7 }
 0x324   :  { %v2113_v42 = vpop.f32.mrf.mxu0 }
 0x325   :  { %v2445_v47 = vmax.f32 %v2112_v36, 0.0 }
 0x326   :  { %v2116_v6 = vpop.f32.mrf.mxu0 }
 0x327   :  { %v2489_v26 = vpack.c.bf16 %v2445_v47, %v2444_v62  ;;  %v2117_v52 = vadd.f32 %v2116_v6, %v4620_v46  ;;  %v2522_v47 = vsub.s32 0, %v2521_v50  ;;  %v2526_v6 = vsub.s32 1, %v2521_v50 }
 0x328   :  { %v2118_v38 = vpop.f32.mrf.mxu0 }
 0x329   :  { %2833 = vmatmul.mubr.bf16.gmra.mxu1 %v2489_v26  ;;  %v2446_v29 = vmax.f32 %v2117_v52, 0.0  ;;  %v2518_v38 = vld [vmem:[%s4909_s5] sm:$0x3]  ;;  %s4284_s5 = smov [#allocation11]  }
 0x32a   :  { %v2119_v17 = vpop.f32.mrf.mxu0  ;;  %2842 = vmatprep.mubr.bf16.mxu1 %v4283_v35  ;;  %s3416_s22 = sshll.u32 %s4284_s5, 4  ;;  %s3417_s22 = int_to_ptr.vmem [resolvable:$true] %s3416_s22 }
 0x32b   :  { %v2120_v57 = vadd.f32 %v2119_v17, %v4623_v21  ;;  %s4245_s23 = scalar_lea.vmem %s3417_s22, 8192  ;;  %p4250_p7 = scmp.lt.s32.totalorder %s3417_s22, %s3417_s22 }
 0x32c   :  { %v2121_v28 = vpop.f32.mrf.mxu0  ;;  %p4246_p6 = scmp.ne.s32.totalorder %s3417_s22, %s4245_s23  ;;  %p4251_p8 = scmp.lt.s32.totalorder %s4245_s23, %s4245_s23 }
 0x32d   :  { %v2447_v3 = vmax.f32 %v2120_v57, 0.0  ;;  %v4745_v57 = vrot.slane %v2518_v38, %v2522_v47  ;;  %v4747_v28 = vrot.slane %v2518_v38, %v2526_v6 }
 0x32e   :  { %v2124_v49 = vpop.f32.mrf.mxu0  ;;  %p4252_p9 = por %p4251_p8, %p4250_p7 }
 0x32f   :  { %v2490_v20 = vpack.c.bf16 %v2447_v3, %v2446_v29  ;;  %v2125_v31 = vadd.f32 %v2124_v49, %v4626_v55 }
 0x330   :  { %v2126_v56 = vpop.f32.mrf.mxu0  ;;  %p4253_p10 = pnand %p4252_p9, %p4246_p6 }
 0x331   :  { %2843 = vmatmul.mubr.bf16.gmra.mxu1 %v2490_v20  ;;  %v2448_v8 = vmax.f32 %v2125_v31, 0.0 }
 0x332   :  { %v2127_v40 = vpop.f32.mrf.mxu0  ;;  %2852 = vmatprep.mubr.bf16.mxu1 %v4283_v35 }
 0x333   :  { %v2128_v46 = vadd.f32 %v2127_v40, %v4630_v10 }
 0x334   :  { %v2129_v0 = vpop.f32.mrf.mxu0 }
 0x335   :  { %v2449_v45 = vmax.f32 %v2128_v46, 0.0 }
 0x336   :  { %v2132_v59 = vpop.f32.mrf.mxu0 }
 0x337   :  { %v2491_v11 = vpack.c.bf16 %v2449_v45, %v2448_v8  ;;  %v2133_v27 = vadd.f32 %v2132_v59, %v4633_v18 }
 0x338   :  { %v2134_v21 = vpop.f32.mrf.mxu0 }
 0x339   :  { %2853 = vmatmul.mubr.bf16.gmra.mxu1 %v2491_v11  ;;  %v2450_v34 = vmax.f32 %v2133_v27, 0.0 }
 0x33a   :  { %v2135_v60 = vpop.f32.mrf.mxu0  ;;  %2862 = vmatprep.mubr.bf16.mxu1 %v4283_v35 }
 0x33b   :  { %v2136_v55 = vadd.f32 %v2135_v60, %v4637_v15 }
 0x33c   :  { %v2137_v7 = vpop.f32.mrf.mxu0 }
 0x33d   :  { %v2451_v12 = vmax.f32 %v2136_v55, 0.0 }
 0x33e   :  { %v2140_v23 = vpop.f32.mrf.mxu0 }
 0x33f   :  { %v2492_v2 = vpack.c.bf16 %v2451_v12, %v2450_v34  ;;  %v2141_v16 = vadd.f32 %v2140_v23, %v4640_v32 }
 0x340   :  { %v2142_v10 = vpop.f32.mrf.mxu0 }
 0x341   :  { %2863 = vmatmul.mubr.bf16.gmra.mxu1 %v2492_v2  ;;  %v2452_v44 = vmax.f32 %v2141_v16, 0.0 }
 0x342   :  { %v2143_v5 = vpop.f32.mrf.mxu0  ;;  %2872 = vmatprep.mubr.bf16.mxu1 %v4283_v35 }
 0x343   :  { %v2144_v18 = vadd.f32 %v2143_v5, %v4644_v24 }
 0x344   :  { %v2145_v48 = vpop.f32.mrf.mxu0 }
 0x345   :  { %v2453_v51 = vmax.f32 %v2144_v18, 0.0 }
 0x346   :  { %v2148_v22 = vpop.f32.mrf.mxu0 }
 0x347   :  { %v2493_v15 = vpack.c.bf16 %v2453_v51, %v2452_v44  ;;  %v2149_v36 = vadd.f32 %v2148_v22, %v4647_v43 }
 0x348   :  { %v2150_v1 = vpop.f32.mrf.mxu0 }
 0x349   :  { %2873 = vmatmul.mubr.bf16.gmra.mxu1 %v2493_v15  ;;  %v2454_v24 = vmax.f32 %v2149_v36, 0.0 }
 0x34a   :  { %v2151_v42 = vpop.f32.mrf.mxu0  ;;  %2882 = vmatprep.mubr.bf16.mxu1 %v4283_v35 }
 0x34b   :  { %v2152_v32 = vadd.f32 %v2151_v42, %v4651_v41 }
 0x34c   :  { %v2153_v62 = vpop.f32.mrf.mxu0 }
 0x34d   :  { %v2455_v26 = vmax.f32 %v2152_v32, 0.0 }
 0x34e   :  { %v2156_v52 = vpop.f32.mrf.mxu0 }
 0x34f   :  { %v2494_v17 = vpack.c.bf16 %v2455_v26, %v2454_v24  ;;  %v2157_v29 = vadd.f32 %v2156_v52, %v4654_v63 }
 0x350   :  { %v2158_v43 = vpop.f32.mrf.mxu0 }
 0x351   :  { %v2644_v3 = vpop.f32.mrf.mxu1  ;;  %2883 = vmatmul.mubr.bf16.gmra.mxu1 %v2494_v17  ;;  %v2456_v46 = vmax.f32 %v2157_v29, 0.0 }
 0x352   :  { %v2159_v41 = vpop.f32.mrf.mxu0  ;;  %2892 = vmatprep.mubr.bf16.mxu1 %v4283_v35  ;;  %v2645_v56 = vadd.f32 %v2644_v3, %v4745_v57 }
 0x353   :  { %v2646_v49 = vpop.f32.mrf.mxu1  ;;  %v2160_v20 = vadd.f32 %v2159_v41, %v4658_v39 }
 0x354   :  { %v2647_v31 = vadd.f32 %v2646_v49, %v4747_v28  ;;  %v2161_v40 = vpop.f32.mrf.mxu0 }
 0x355   :  { %v2457_v0 = vmax.f32 %v2160_v20, 0.0  ;;  %v2648_v8 = vpop.f32.mrf.mxu1 }
 0x356   :  { %v3681_v45 = vpack.c.bf16 %v2647_v31, %v2645_v56  ;;  %v2164_v59 = vpop.f32.mrf.mxu0  ;;  %v2649_v21 = vadd.f32 %v2648_v8, %v4745_v57 }
 0x357   :  { %v2495_v11 = vpack.c.bf16 %v2457_v0, %v2456_v46  ;;  %v2650_v63 = vpop.f32.mrf.mxu1  ;;  %v2165_v39 = vadd.f32 %v2164_v59, %v4661_v61 }
 0x358   :  { %3347 = vst [vmem:[#allocation11] sm:$0xff] %v3681_v45  ;;  %v2651_v27 = vadd.f32 %v2650_v63, %v4747_v28  ;;  %v2166_v60 = vpop.f32.mrf.mxu0 }
 0x359   :  { %v2654_v55 = vpop.f32.mrf.mxu1  ;;  %2893 = vmatmul.mubr.bf16.gmra.mxu1 %v2495_v11  ;;  %v2458_v5 = vmax.f32 %v2165_v39, 0.0 }
 0x35a   :  { %v3682_v7 = vpack.c.bf16 %v2651_v27, %v2649_v21  ;;  %v2167_v34 = vpop.f32.mrf.mxu0  ;;  %2902 = vmatprep.mubr.bf16.mxu1 %v4283_v35  ;;  %v2655_v2 = vadd.f32 %v2654_v55, %v4745_v57 }
 0x35b   :  { %v2656_v12 = vpop.f32.mrf.mxu1  ;;  %v2168_v23 = vadd.f32 %v2167_v34, %v4665_v53 }
 0x35c   :  { %3348 = vst [vmem:[#allocation11 + $0x8] sm:$0xff] %v3682_v7  ;;  %v2657_v10 = vadd.f32 %v2656_v12, %v4747_v28  ;;  %v2169_v16 = vpop.f32.mrf.mxu0 }
 0x35d   :  { %v2459_v18 = vmax.f32 %v2168_v23, 0.0  ;;  %v2658_v48 = vpop.f32.mrf.mxu1 }
 0x35e   :  { %v3683_v9 = vpack.c.bf16 %v2657_v10, %v2655_v2  ;;  %v2172_v61 = vpop.f32.mrf.mxu0  ;;  %v2659_v22 = vadd.f32 %v2658_v48, %v4745_v57 }
 0x35f   :  { %v2496_v44 = vpack.c.bf16 %v2459_v18, %v2458_v5  ;;  %v2660_v51 = vpop.f32.mrf.mxu1  ;;  %v2173_v53 = vadd.f32 %v2172_v61, %v4668_v13 }
 0x360   :  { %3349 = vst [vmem:[#allocation11 + $0x10] sm:$0xff] %v3683_v9  ;;  %v2661_v15 = vadd.f32 %v2660_v51, %v4747_v28  ;;  %v2174_v1 = vpop.f32.mrf.mxu0 }
 0x361   :  { %v2664_v50 = vpop.f32.mrf.mxu1  ;;  %2903 = vmatmul.mubr.bf16.gmra.mxu1 %v2496_v44  ;;  %v2460_v26 = vmax.f32 %v2173_v53, 0.0 }
 0x362   :  { %v3684_v36 = vpack.c.bf16 %v2661_v15, %v2659_v22  ;;  %v2175_v42 = vpop.f32.mrf.mxu0  ;;  %2912 = vmatprep.mubr.bf16.mxu1 %v4283_v35  ;;  %v2665_v47 = vadd.f32 %v2664_v50, %v4745_v57 }
 0x363   :  { %v2666_v32 = vpop.f32.mrf.mxu1  ;;  %v2176_v62 = vadd.f32 %v2175_v42, %v4672_v33 }
 0x364   :  { %3350 = vst [vmem:[#allocation11 + $0x18] sm:$0xff] %v3684_v36  ;;  %v2667_v6 = vadd.f32 %v2666_v32, %v4747_v28  ;;  %v2177_v24 = vpop.f32.mrf.mxu0 }
 0x365   :  { %v2461_v38 = vmax.f32 %v2176_v62, 0.0  ;;  %v2668_v52 = vpop.f32.mrf.mxu1 }
 0x366   :  { %v3685_v17 = vpack.c.bf16 %v2667_v6, %v2665_v47  ;;  %v2180_v13 = vpop.f32.mrf.mxu0  ;;  %v2669_v3 = vadd.f32 %v2668_v52, %v4745_v57 }
 0x367   :  { %v2497_v43 = vpack.c.bf16 %v2461_v38, %v2460_v26  ;;  %v2670_v29 = vpop.f32.mrf.mxu1  ;;  %v2181_v33 = vadd.f32 %v2180_v13, %v4675_v25 }
 0x368   :  { %3351 = vst [vmem:[#allocation11 + $0x20] sm:$0xff] %v3685_v17  ;;  %v2671_v41 = vadd.f32 %v2670_v29, %v4747_v28  ;;  %v2182_v49 = vpop.f32.mrf.mxu0 }
 0x369   :  { %v2674_v20 = vpop.f32.mrf.mxu1  ;;  %2913 = vmatmul.mubr.bf16.gmra.mxu1 %v2497_v43  ;;  %v2462_v59 = vmax.f32 %v2181_v33, 0.0 }
 0x36a   :  { %v3686_v56 = vpack.c.bf16 %v2671_v41, %v2669_v3  ;;  %v2183_v31 = vpop.f32.mrf.mxu0  ;;  %2922 = vmatprep.mubr.bf16.mxu1 %v4283_v35  ;;  %v2675_v0 = vadd.f32 %v2674_v20, %v4745_v57 }
 0x36b   :  { %v2676_v40 = vpop.f32.mrf.mxu1  ;;  %v2184_v46 = vadd.f32 %v2183_v31, %v4679_v4 }
 0x36c   :  { %3352 = vst [vmem:[#allocation11 + $0x28] sm:$0xff] %v3686_v56  ;;  %v2677_v8 = vadd.f32 %v2676_v40, %v4747_v28  ;;  %v2185_v45 = vpop.f32.mrf.mxu0 }
 0x36d   :  { %v2463_v11 = vmax.f32 %v2184_v46, 0.0  ;;  %v2678_v63 = vpop.f32.mrf.mxu1 }
 0x36e   :  { %v3687_v21 = vpack.c.bf16 %v2677_v8, %v2675_v0  ;;  %v2188_v25 = vpop.f32.mrf.mxu0  ;;  %v2679_v39 = vadd.f32 %v2678_v63, %v4745_v57 }
 0x36f   :  { %v2498_v27 = vpack.c.bf16 %v2463_v11, %v2462_v59  ;;  %v2680_v60 = vpop.f32.mrf.mxu1  ;;  %v2189_v4 = vadd.f32 %v2188_v25, %v4682_v30 }
 0x370   :  { %3353 = vst [vmem:[#allocation11 + $0x30] sm:$0xff] %v3687_v21  ;;  %v2681_v55 = vadd.f32 %v2680_v60, %v4747_v28  ;;  %v2190_v7 = vpop.f32.mrf.mxu0 }
 0x371   :  { %v2684_v34 = vpop.f32.mrf.mxu1  ;;  %2923 = vmatmul.mubr.bf16.gmra.mxu1 %v2498_v27  ;;  %v2464_v48 = vmax.f32 %v2189_v4, 0.0 }
 0x372   :  { %v3688_v12 = vpack.c.bf16 %v2681_v55, %v2679_v39  ;;  %v2191_v23 = vpop.f32.mrf.mxu0  ;;  %2932 = vmatprep.mubr.bf16.mxu1 %v4283_v35  ;;  %v2685_v16 = vadd.f32 %v2684_v34, %v4745_v57 }
 0x373   :  { %v2686_v2 = vpop.f32.mrf.mxu1  ;;  %v2192_v10 = vadd.f32 %v2191_v23, %v4686_v54 }
 0x374   :  { %3354 = vst [vmem:[#allocation11 + $0x38] sm:$0xff] %v3688_v12  ;;  %v2687_v5 = vadd.f32 %v2686_v2, %v4747_v28  ;;  %v2193_v18 = vpop.f32.mrf.mxu0 }
 0x375   :  { %v2465_v9 = vmax.f32 %v2192_v10, 0.0  ;;  %v2688_v61 = vpop.f32.mrf.mxu1 }
 0x376   :  { %v3689_v44 = vpack.c.bf16 %v2687_v5, %v2685_v16  ;;  %v2196_v30 = vpop.f32.mrf.mxu0  ;;  %v2689_v15 = vadd.f32 %v2688_v61, %v4745_v57 }
 0x377   :  { %v2499_v51 = vpack.c.bf16 %v2465_v9, %v2464_v48  ;;  %v2690_v22 = vpop.f32.mrf.mxu1  ;;  %v2197_v54 = vadd.f32 %v2196_v30, %v4689_v19 }
 0x378   :  { %3355 = vst [vmem:[#allocation11 + $0x40] sm:$0xff] %v3689_v44  ;;  %v2691_v1 = vadd.f32 %v2690_v22, %v4747_v28  ;;  %v2198_v53 = vpop.f32.mrf.mxu0 }
 0x379   :  { %v2694_v50 = vpop.f32.mrf.mxu1  ;;  %2933 = vmatmul.mubr.bf16.gmra.mxu1 %v2499_v51  ;;  %v2466_v26 = vmax.f32 %v2197_v54, 0.0 }
 0x37a   :  { %v3690_v36 = vpack.c.bf16 %v2691_v1, %v2689_v15  ;;  %v2199_v42 = vpop.f32.mrf.mxu0  ;;  %2942 = vmatprep.mubr.bf16.mxu1 %v4283_v35  ;;  %v2695_v47 = vadd.f32 %v2694_v50, %v4745_v57 }
 0x37b   :  { %v2696_v32 = vpop.f32.mrf.mxu1  ;;  %v2200_v62 = vadd.f32 %v2199_v42, %v4693_v14 }
 0x37c   :  { %3356 = vst [vmem:[#allocation11 + $0x48] sm:$0xff] %v3690_v36  ;;  %v2697_v6 = vadd.f32 %v2696_v32, %v4747_v28  ;;  %v2201_v24 = vpop.f32.mrf.mxu0 }
 0x37d   :  { %v2467_v38 = vmax.f32 %v2200_v62, 0.0  ;;  %v2698_v52 = vpop.f32.mrf.mxu1 }
 0x37e   :  { %v3691_v17 = vpack.c.bf16 %v2697_v6, %v2695_v47  ;;  %v2204_v19 = vpop.f32.mrf.mxu0  ;;  %v2699_v29 = vadd.f32 %v2698_v52, %v4745_v57 }
 0x37f   :  { %v2500_v13 = vpack.c.bf16 %v2467_v38, %v2466_v26  ;;  %v2700_v43 = vpop.f32.mrf.mxu1  ;;  %v2205_v14 = vadd.f32 %v2204_v19, %v4696_v37 }
 0x380   :  { %3357 = vst [vmem:[#allocation11 + $0x50] sm:$0xff] %v3691_v17  ;;  %v2701_v3 = vadd.f32 %v2700_v43, %v4747_v28  ;;  %v2206_v41 = vpop.f32.mrf.mxu0 }
 0x381   :  { %v2704_v49 = vpop.f32.mrf.mxu1  ;;  %2943 = vmatmul.mubr.bf16.gmra.mxu1 %v2500_v13  ;;  %v2468_v8 = vmax.f32 %v2205_v14, 0.0 }
 0x382   :  { %v3692_v33 = vpack.c.bf16 %v2701_v3, %v2699_v29  ;;  %v2207_v20 = vpop.f32.mrf.mxu0  ;;  %2952 = vmatprep.mubr.bf16.mxu1 %v4283_v35  ;;  %v2705_v40 = vadd.f32 %v2704_v49, %v4745_v57 }
 0x383   :  { %v2706_v56 = vpop.f32.mrf.mxu1  ;;  %v2208_v31 = vadd.f32 %v2207_v20, %v4700_v58 }
 0x384   :  { %3358 = vst [vmem:[#allocation11 + $0x58] sm:$0xff] %v3692_v33  ;;  %v2707_v46 = vadd.f32 %v2706_v56, %v4747_v28  ;;  %v2209_v0 = vpop.f32.mrf.mxu0 }
 0x385   :  { %v2469_v45 = vmax.f32 %v2208_v31, 0.0  ;;  %v2708_v59 = vpop.f32.mrf.mxu1 }
 0x386   :  { %v3693_v11 = vpack.c.bf16 %v2707_v46, %v2705_v40  ;;  %v2709_v21 = vadd.f32 %v2708_v59, %v4745_v57 }
 0x387   :  { %v2501_v37 = vpack.c.bf16 %v2469_v45, %v2468_v8  ;;  %v2710_v63 = vpop.f32.mrf.mxu1 }
 0x388   :  { %3359 = vst [vmem:[#allocation11 + $0x60] sm:$0xff] %v3693_v11  ;;  %v2711_v35 = vadd.f32 %v2710_v63, %v4747_v28 }
 0x389   :  { %v2714_v25 = vpop.f32.mrf.mxu1  ;;  %2953 = vmatmul.mubr.bf16.gmra.mxu1 %v2501_v37 }
 0x38a   :  { %v3694_v58 = vpack.c.bf16 %v2711_v35, %v2709_v21  ;;  %v2715_v60 = vadd.f32 %v2714_v25, %v4745_v57 }
 0x38b   :  { %v2716_v27 = vpop.f32.mrf.mxu1 }
 0x38c   :  { %3360 = vst [vmem:[#allocation11 + $0x68] sm:$0xff] %v3694_v58  ;;  %v2717_v39 = vadd.f32 %v2716_v27, %v4747_v28 }
 0x38d   :  { %v2718_v55 = vpop.f32.mrf.mxu1 }
 0x38e   :  { %v3695_v7 = vpack.c.bf16 %v2717_v39, %v2715_v60  ;;  %v2719_v34 = vadd.f32 %v2718_v55, %v4745_v57 }
 0x38f   :  { %v2720_v4 = vpop.f32.mrf.mxu1 }
 0x390   :  { %3361 = vst [vmem:[#allocation11 + $0x70] sm:$0xff] %v3695_v7  ;;  %v2721_v12 = vadd.f32 %v2720_v4, %v4747_v28 }
 0x391   :  { %v2724_v23 = vpop.f32.mrf.mxu1 }
 0x392   :  { %v3696_v2 = vpack.c.bf16 %v2721_v12, %v2719_v34  ;;  %v2725_v16 = vadd.f32 %v2724_v23, %v4745_v57 }
 0x393   :  { %v2726_v10 = vpop.f32.mrf.mxu1 }
 0x394   :  { %3362 = vst [vmem:[#allocation11 + $0x78] sm:$0xff] %v3696_v2  ;;  %v2727_v5 = vadd.f32 %v2726_v10, %v4747_v28 }
 0x395   :  { %v2728_v18 = vpop.f32.mrf.mxu1 }
 0x396   :  { %v3697_v48 = vpack.c.bf16 %v2727_v5, %v2725_v16  ;;  %v2729_v61 = vadd.f32 %v2728_v18, %v4745_v57 }
 0x397   :  { %v2730_v9 = vpop.f32.mrf.mxu1 }
 0x398   :  { %3363 = vst [vmem:[#allocation11 + $0x80] sm:$0xff] %v3697_v48  ;;  %v2731_v44 = vadd.f32 %v2730_v9, %v4747_v28 }
 0x399   :  { %v2734_v30 = vpop.f32.mrf.mxu1 }
 0x39a   :  { %v3698_v51 = vpack.c.bf16 %v2731_v44, %v2729_v61  ;;  %v2735_v15 = vadd.f32 %v2734_v30, %v4745_v57 }
 0x39b   :  { %v2736_v22 = vpop.f32.mrf.mxu1 }
 0x39c   :  { %3364 = vst [vmem:[#allocation11 + $0x88] sm:$0xff] %v3698_v51  ;;  %v2737_v1 = vadd.f32 %v2736_v22, %v4747_v28 }
 0x39d   :  { %v2738_v53 = vpop.f32.mrf.mxu1 }
 0x39e   :  { %v3699_v54 = vpack.c.bf16 %v2737_v1, %v2735_v15  ;;  %v2739_v36 = vadd.f32 %v2738_v53, %v4745_v57 }
 0x39f   :  { %v2740_v50 = vpop.f32.mrf.mxu1 }
 0x3a0   :  { %3365 = vst [vmem:[#allocation11 + $0x90] sm:$0xff] %v3699_v54  ;;  %v2741_v42 = vadd.f32 %v2740_v50, %v4747_v28 }
 0x3a1   :  { %v2744_v32 = vpop.f32.mrf.mxu1 }
 0x3a2   :  { %v3700_v62 = vpack.c.bf16 %v2741_v42, %v2739_v36  ;;  %v2745_v6 = vadd.f32 %v2744_v32, %v4745_v57 }
 0x3a3   :  { %v2746_v47 = vpop.f32.mrf.mxu1 }
 0x3a4   :  { %3366 = vst [vmem:[#allocation11 + $0x98] sm:$0xff] %v3700_v62  ;;  %v2747_v24 = vadd.f32 %v2746_v47, %v4747_v28 }
 0x3a5   :  { %v2748_v26 = vpop.f32.mrf.mxu1 }
 0x3a6   :  { %v3701_v38 = vpack.c.bf16 %v2747_v24, %v2745_v6  ;;  %v2749_v17 = vadd.f32 %v2748_v26, %v4745_v57 }
 0x3a7   :  { %v2750_v52 = vpop.f32.mrf.mxu1 }
 0x3a8   :  { %3367 = vst [vmem:[#allocation11 + $0xa0] sm:$0xff] %v3701_v38  ;;  %v2751_v19 = vadd.f32 %v2750_v52, %v4747_v28 }
 0x3a9   :  { %v2754_v13 = vpop.f32.mrf.mxu1 }
 0x3aa   :  { %v3702_v43 = vpack.c.bf16 %v2751_v19, %v2749_v17  ;;  %v2755_v3 = vadd.f32 %v2754_v13, %v4745_v57 }
 0x3ab   :  { %v2756_v29 = vpop.f32.mrf.mxu1 }
 0x3ac   :  { %3368 = vst [vmem:[#allocation11 + $0xa8] sm:$0xff] %v3702_v43  ;;  %v2757_v41 = vadd.f32 %v2756_v29, %v4747_v28 }
 0x3ad   :  { %v2758_v14 = vpop.f32.mrf.mxu1 }
 0x3ae   :  { %v3703_v49 = vpack.c.bf16 %v2757_v41, %v2755_v3  ;;  %v2759_v20 = vadd.f32 %v2758_v14, %v4745_v57 }
 0x3af   :  { %v2760_v33 = vpop.f32.mrf.mxu1 }
 0x3b0   :  { %3369 = vst [vmem:[#allocation11 + $0xb0] sm:$0xff] %v3703_v49  ;;  %v2761_v56 = vadd.f32 %v2760_v33, %v4747_v28 }
 0x3b1   :  { %v2764_v31 = vpop.f32.mrf.mxu1 }
 0x3b2   :  { %v3704_v40 = vpack.c.bf16 %v2761_v56, %v2759_v20  ;;  %v2765_v0 = vadd.f32 %v2764_v31, %v4745_v57 }
 0x3b3   :  { %v2766_v46 = vpop.f32.mrf.mxu1 }
 0x3b4   :  { %3370 = vst [vmem:[#allocation11 + $0xb8] sm:$0xff] %v3704_v40  ;;  %v2767_v8 = vadd.f32 %v2766_v46, %v4747_v28 }
 0x3b5   :  { %v2768_v45 = vpop.f32.mrf.mxu1 }
 0x3b6   :  { %v3705_v59 = vpack.c.bf16 %v2767_v8, %v2765_v0  ;;  %v2769_v37 = vadd.f32 %v2768_v45, %v4745_v57 }
 0x3b7   :  { %v2770_v11 = vpop.f32.mrf.mxu1 }
 0x3b8   :  { %3371 = vst [vmem:[#allocation11 + $0xc0] sm:$0xff] %v3705_v59  ;;  %v2771_v63 = vadd.f32 %v2770_v11, %v4747_v28 }
 0x3b9   :  { %v2774_v21 = vpop.f32.mrf.mxu1 }
 0x3ba   :  { %v3706_v35 = vpack.c.bf16 %v2771_v63, %v2769_v37  ;;  %v2775_v58 = vadd.f32 %v2774_v21, %v4745_v57 }
 0x3bb   :  { %v2776_v25 = vpop.f32.mrf.mxu1 }
 0x3bc   :  { %3372 = vst [vmem:[#allocation11 + $0xc8] sm:$0xff] %v3706_v35  ;;  %v2777_v27 = vadd.f32 %v2776_v25, %v4747_v28 }
 0x3bd   :  { %v2778_v60 = vpop.f32.mrf.mxu1 }
 0x3be   :  { %v3707_v39 = vpack.c.bf16 %v2777_v27, %v2775_v58  ;;  %v2779_v7 = vadd.f32 %v2778_v60, %v4745_v57 }
 0x3bf   :  { %v2780_v55 = vpop.f32.mrf.mxu1 }
 0x3c0   :  { %3373 = vst [vmem:[#allocation11 + $0xd0] sm:$0xff] %v3707_v39  ;;  %v2781_v4 = vadd.f32 %v2780_v55, %v4747_v28 }
 0x3c1   :  { %v2784_v34 = vpop.f32.mrf.mxu1 }
 0x3c2   :  { %v3708_v12 = vpack.c.bf16 %v2781_v4, %v2779_v7  ;;  %v2785_v2 = vadd.f32 %v2784_v34, %v4745_v57 }
 0x3c3   :  { %v2786_v23 = vpop.f32.mrf.mxu1 }
 0x3c4   :  { %3374 = vst [vmem:[#allocation11 + $0xd8] sm:$0xff] %v3708_v12  ;;  %v2787_v10 = vadd.f32 %v2786_v23, %v4747_v28 }
 0x3c5   :  { %v2788_v16 = vpop.f32.mrf.mxu1 }
 0x3c6   :  { %v3709_v5 = vpack.c.bf16 %v2787_v10, %v2785_v2  ;;  %v2789_v48 = vadd.f32 %v2788_v16, %v4745_v57 }
 0x3c7   :  { %v2790_v18 = vpop.f32.mrf.mxu1 }
 0x3c8   :  { %3375 = vst [vmem:[#allocation11 + $0xe0] sm:$0xff] %v3709_v5  ;;  %v2791_v9 = vadd.f32 %v2790_v18, %v4747_v28 }
 0x3c9   :  { %v2794_v61 = vpop.f32.mrf.mxu1 }
 0x3ca   :  { %v3710_v44 = vpack.c.bf16 %v2791_v9, %v2789_v48  ;;  %v2795_v51 = vadd.f32 %v2794_v61, %v4745_v57 }
 0x3cb   :  { %v2796_v30 = vpop.f32.mrf.mxu1 }
 0x3cc   :  { %3376 = vst [vmem:[#allocation11 + $0xe8] sm:$0xff] %v3710_v44  ;;  %v2797_v22 = vadd.f32 %v2796_v30, %v4747_v28 }
 0x3cd   :  { %v2798_v15 = vpop.f32.mrf.mxu1 }
 0x3ce   :  { %v3711_v1 = vpack.c.bf16 %v2797_v22, %v2795_v51  ;;  %v2799_v54 = vadd.f32 %v2798_v15, %v4745_v57 }
 0x3cf   :  { %v2800_v53 = vpop.f32.mrf.mxu1 }
 0x3d0   :  { %3377 = vst [vmem:[#allocation11 + $0xf0] sm:$0xff] %v3711_v1  ;;  %v2801_v50 = vadd.f32 %v2800_v53, %v4747_v28 }
 0x3d1   :  { %v2804_v36 = vpop.f32.mrf.mxu1 }
 0x3d2   :  { %v3712_v42 = vpack.c.bf16 %v2801_v50, %v2799_v54  ;;  %v2805_v62 = vadd.f32 %v2804_v36, %v4745_v57 }
 0x3d3   :  { %v2806_v32 = vpop.f32.mrf.mxu1 }
 0x3d4   :  { %3378 = vst [vmem:[#allocation11 + $0xf8] sm:$0xff] %v3712_v42  ;;  %v2807_v47 = vadd.f32 %v2806_v32, %v4747_v28 }
 0x3d5   :  { %v2808_v6 = vpop.f32.mrf.mxu1 }
 0x3d6   :  { %v3713_v24 = vpack.c.bf16 %v2807_v47, %v2805_v62  ;;  %v2809_v38 = vadd.f32 %v2808_v6, %v4745_v57 }
 0x3d7   :  { %v2810_v26 = vpop.f32.mrf.mxu1 }
 0x3d8   :  { %3379 = vst [vmem:[#allocation11 + $0x100] sm:$0xff] %v3713_v24  ;;  %v2811_v52 = vadd.f32 %v2810_v26, %v4747_v28 }
 0x3d9   :  { %v2814_v17 = vpop.f32.mrf.mxu1 }
 0x3da   :  { %v3714_v19 = vpack.c.bf16 %v2811_v52, %v2809_v38  ;;  %v2815_v43 = vadd.f32 %v2814_v17, %v4745_v57 }
 0x3db   :  { %v2816_v13 = vpop.f32.mrf.mxu1 }
 0x3dc   :  { %3380 = vst [vmem:[#allocation11 + $0x108] sm:$0xff] %v3714_v19  ;;  %v2817_v29 = vadd.f32 %v2816_v13, %v4747_v28 }
 0x3dd   :  { %v2818_v3 = vpop.f32.mrf.mxu1 }
 0x3de   :  { %v3715_v41 = vpack.c.bf16 %v2817_v29, %v2815_v43  ;;  %v2819_v49 = vadd.f32 %v2818_v3, %v4745_v57 }
 0x3df   :  { %v2820_v14 = vpop.f32.mrf.mxu1 }
 0x3e0   :  { %3381 = vst [vmem:[#allocation11 + $0x110] sm:$0xff] %v3715_v41  ;;  %v2821_v33 = vadd.f32 %v2820_v14, %v4747_v28 }
 0x3e1   :  { %v2824_v20 = vpop.f32.mrf.mxu1 }
 0x3e2   :  { %v3716_v56 = vpack.c.bf16 %v2821_v33, %v2819_v49  ;;  %v2825_v40 = vadd.f32 %v2824_v20, %v4745_v57 }
 0x3e3   :  { %v2826_v31 = vpop.f32.mrf.mxu1 }
 0x3e4   :  { %3382 = vst [vmem:[#allocation11 + $0x118] sm:$0xff] %v3716_v56  ;;  %v2827_v46 = vadd.f32 %v2826_v31, %v4747_v28 }
 0x3e5   :  { %v2828_v0 = vpop.f32.mrf.mxu1 }
 0x3e6   :  { %v3717_v8 = vpack.c.bf16 %v2827_v46, %v2825_v40  ;;  %v2829_v59 = vadd.f32 %v2828_v0, %v4745_v57 }
 0x3e7   :  { %v2830_v45 = vpop.f32.mrf.mxu1 }
 0x3e8   :  { %3383 = vst [vmem:[#allocation11 + $0x120] sm:$0xff] %v3717_v8  ;;  %v2831_v11 = vadd.f32 %v2830_v45, %v4747_v28 }
 0x3e9   :  { %v2834_v37 = vpop.f32.mrf.mxu1 }
 0x3ea   :  { %v3718_v63 = vpack.c.bf16 %v2831_v11, %v2829_v59  ;;  %v2835_v35 = vadd.f32 %v2834_v37, %v4745_v57 }
 0x3eb   :  { %v2836_v21 = vpop.f32.mrf.mxu1 }
 0x3ec   :  { %3384 = vst [vmem:[#allocation11 + $0x128] sm:$0xff] %v3718_v63  ;;  %v2837_v25 = vadd.f32 %v2836_v21, %v4747_v28 }
 0x3ed   :  { %v2838_v58 = vpop.f32.mrf.mxu1 }
 0x3ee   :  { %v3719_v27 = vpack.c.bf16 %v2837_v25, %v2835_v35  ;;  %v2839_v39 = vadd.f32 %v2838_v58, %v4745_v57 }
 0x3ef   :  { %v2840_v60 = vpop.f32.mrf.mxu1 }
 0x3f0   :  { %3385 = vst [vmem:[#allocation11 + $0x130] sm:$0xff] %v3719_v27  ;;  %v2841_v55 = vadd.f32 %v2840_v60, %v4747_v28 }
 0x3f1   :  { %v2844_v7 = vpop.f32.mrf.mxu1 }
 0x3f2   :  { %v3720_v4 = vpack.c.bf16 %v2841_v55, %v2839_v39  ;;  %v2845_v12 = vadd.f32 %v2844_v7, %v4745_v57 }
 0x3f3   :  { %v2846_v34 = vpop.f32.mrf.mxu1 }
 0x3f4   :  { %3386 = vst [vmem:[#allocation11 + $0x138] sm:$0xff] %v3720_v4  ;;  %v2847_v23 = vadd.f32 %v2846_v34, %v4747_v28 }
 0x3f5   :  { %v2848_v2 = vpop.f32.mrf.mxu1 }
 0x3f6   :  { %v3721_v10 = vpack.c.bf16 %v2847_v23, %v2845_v12  ;;  %v2849_v5 = vadd.f32 %v2848_v2, %v4745_v57 }
 0x3f7   :  { %v2850_v16 = vpop.f32.mrf.mxu1 }
 0x3f8   :  { %3387 = vst [vmem:[#allocation11 + $0x140] sm:$0xff] %v3721_v10  ;;  %v2851_v18 = vadd.f32 %v2850_v16, %v4747_v28 }
 0x3f9   :  { %v2854_v48 = vpop.f32.mrf.mxu1 }
 0x3fa   :  { %v3722_v9 = vpack.c.bf16 %v2851_v18, %v2849_v5  ;;  %v2855_v44 = vadd.f32 %v2854_v48, %v4745_v57 }
 0x3fb   :  { %v2856_v61 = vpop.f32.mrf.mxu1 }
 0x3fc   :  { %3388 = vst [vmem:[#allocation11 + $0x148] sm:$0xff] %v3722_v9  ;;  %v2857_v30 = vadd.f32 %v2856_v61, %v4747_v28 }
 0x3fd   :  { %v2858_v51 = vpop.f32.mrf.mxu1 }
 0x3fe   :  { %v3723_v22 = vpack.c.bf16 %v2857_v30, %v2855_v44  ;;  %v2859_v1 = vadd.f32 %v2858_v51, %v4745_v57 }
 0x3ff   :  { %v2860_v15 = vpop.f32.mrf.mxu1 }
 0x400   :  { %3389 = vst [vmem:[#allocation11 + $0x150] sm:$0xff] %v3723_v22  ;;  %v2861_v53 = vadd.f32 %v2860_v15, %v4747_v28 }
 0x401   :  { %v2864_v54 = vpop.f32.mrf.mxu1 }
 0x402   :  { %v3724_v50 = vpack.c.bf16 %v2861_v53, %v2859_v1  ;;  %v2865_v42 = vadd.f32 %v2864_v54, %v4745_v57 }
 0x403   :  { %v2866_v36 = vpop.f32.mrf.mxu1 }
 0x404   :  { %3390 = vst [vmem:[#allocation11 + $0x158] sm:$0xff] %v3724_v50  ;;  %v2867_v32 = vadd.f32 %v2866_v36, %v4747_v28 }
 0x405   :  { %v2868_v62 = vpop.f32.mrf.mxu1 }
 0x406   :  { %v3725_v47 = vpack.c.bf16 %v2867_v32, %v2865_v42  ;;  %v2869_v24 = vadd.f32 %v2868_v62, %v4745_v57 }
 0x407   :  { %v2870_v6 = vpop.f32.mrf.mxu1 }
 0x408   :  { %3391 = vst [vmem:[#allocation11 + $0x160] sm:$0xff] %v3725_v47  ;;  %v2871_v26 = vadd.f32 %v2870_v6, %v4747_v28 }
 0x409   :  { %v2874_v38 = vpop.f32.mrf.mxu1 }
 0x40a   :  { %v3726_v52 = vpack.c.bf16 %v2871_v26, %v2869_v24  ;;  %v2875_v19 = vadd.f32 %v2874_v38, %v4745_v57 }
 0x40b   :  { %v2876_v17 = vpop.f32.mrf.mxu1 }
 0x40c   :  { %3392 = vst [vmem:[#allocation11 + $0x168] sm:$0xff] %v3726_v52  ;;  %v2877_v13 = vadd.f32 %v2876_v17, %v4747_v28 }
 0x40d   :  { %v2878_v43 = vpop.f32.mrf.mxu1 }
 0x40e   :  { %v3727_v29 = vpack.c.bf16 %v2877_v13, %v2875_v19  ;;  %v2879_v41 = vadd.f32 %v2878_v43, %v4745_v57 }
 0x40f   :  { %v2880_v3 = vpop.f32.mrf.mxu1 }
 0x410   :  { %3393 = vst [vmem:[#allocation11 + $0x170] sm:$0xff] %v3727_v29  ;;  %v2881_v14 = vadd.f32 %v2880_v3, %v4747_v28 }
 0x411   :  { %v2884_v49 = vpop.f32.mrf.mxu1 }
 0x412   :  { %v3728_v33 = vpack.c.bf16 %v2881_v14, %v2879_v41  ;;  %v2885_v56 = vadd.f32 %v2884_v49, %v4745_v57 }
 0x413   :  { %v2886_v20 = vpop.f32.mrf.mxu1 }
 0x414   :  { %3394 = vst [vmem:[#allocation11 + $0x178] sm:$0xff] %v3728_v33  ;;  %v2887_v31 = vadd.f32 %v2886_v20, %v4747_v28 }
 0x415   :  { %v2888_v40 = vpop.f32.mrf.mxu1 }
 0x416   :  { %v3729_v46 = vpack.c.bf16 %v2887_v31, %v2885_v56  ;;  %v2889_v8 = vadd.f32 %v2888_v40, %v4745_v57 }
 0x417   :  { %v2890_v0 = vpop.f32.mrf.mxu1 }
 0x418   :  { %3395 = vst [vmem:[#allocation11 + $0x180] sm:$0xff] %v3729_v46  ;;  %v2891_v45 = vadd.f32 %v2890_v0, %v4747_v28 }
 0x419   :  { %v2894_v59 = vpop.f32.mrf.mxu1 }
 0x41a   :  { %v3730_v11 = vpack.c.bf16 %v2891_v45, %v2889_v8  ;;  %v2895_v63 = vadd.f32 %v2894_v59, %v4745_v57 }
 0x41b   :  { %v2896_v37 = vpop.f32.mrf.mxu1 }
 0x41c   :  { %3396 = vst [vmem:[#allocation11 + $0x188] sm:$0xff] %v3730_v11  ;;  %v2897_v21 = vadd.f32 %v2896_v37, %v4747_v28 }
 0x41d   :  { %v2898_v35 = vpop.f32.mrf.mxu1 }
 0x41e   :  { %v3731_v25 = vpack.c.bf16 %v2897_v21, %v2895_v63  ;;  %v2899_v27 = vadd.f32 %v2898_v35, %v4745_v57 }
 0x41f   :  { %v2900_v58 = vpop.f32.mrf.mxu1 }
 0x420   :  { %3397 = vst [vmem:[#allocation11 + $0x190] sm:$0xff] %v3731_v25  ;;  %v2901_v60 = vadd.f32 %v2900_v58, %v4747_v28 }
 0x421   :  { %v2904_v39 = vpop.f32.mrf.mxu1 }
 0x422   :  { %v3732_v55 = vpack.c.bf16 %v2901_v60, %v2899_v27  ;;  %v2905_v4 = vadd.f32 %v2904_v39, %v4745_v57 }
 0x423   :  { %v2906_v7 = vpop.f32.mrf.mxu1 }
 0x424   :  { %3398 = vst [vmem:[#allocation11 + $0x198] sm:$0xff] %v3732_v55  ;;  %v2907_v34 = vadd.f32 %v2906_v7, %v4747_v28 }
 0x425   :  { %v2908_v12 = vpop.f32.mrf.mxu1 }
 0x426   :  { %v3733_v23 = vpack.c.bf16 %v2907_v34, %v2905_v4  ;;  %v2909_v10 = vadd.f32 %v2908_v12, %v4745_v57 }
 0x427   :  { %v2910_v2 = vpop.f32.mrf.mxu1 }
 0x428   :  { %3399 = vst [vmem:[#allocation11 + $0x1a0] sm:$0xff] %v3733_v23  ;;  %v2911_v16 = vadd.f32 %v2910_v2, %v4747_v28 }
 0x429   :  { %v2914_v5 = vpop.f32.mrf.mxu1 }
 0x42a   :  { %v3734_v18 = vpack.c.bf16 %v2911_v16, %v2909_v10  ;;  %v2915_v9 = vadd.f32 %v2914_v5, %v4745_v57 }
 0x42b   :  { %v2916_v48 = vpop.f32.mrf.mxu1 }
 0x42c   :  { %3400 = vst [vmem:[#allocation11 + $0x1a8] sm:$0xff] %v3734_v18  ;;  %v2917_v61 = vadd.f32 %v2916_v48, %v4747_v28 }
 0x42d   :  { %v2918_v44 = vpop.f32.mrf.mxu1 }
 0x42e   :  { %v3735_v30 = vpack.c.bf16 %v2917_v61, %v2915_v9  ;;  %v2919_v22 = vadd.f32 %v2918_v44, %v4745_v57 }
 0x42f   :  { %v2920_v51 = vpop.f32.mrf.mxu1 }
 0x430   :  { %3401 = vst [vmem:[#allocation11 + $0x1b0] sm:$0xff] %v3735_v30  ;;  %v2921_v15 = vadd.f32 %v2920_v51, %v4747_v28 }
 0x431   :  { %v2924_v1 = vpop.f32.mrf.mxu1 }
 0x432   :  { %v3736_v53 = vpack.c.bf16 %v2921_v15, %v2919_v22  ;;  %v2925_v50 = vadd.f32 %v2924_v1, %v4745_v57 }
 0x433   :  { %v2926_v54 = vpop.f32.mrf.mxu1 }
 0x434   :  { %3402 = vst [vmem:[#allocation11 + $0x1b8] sm:$0xff] %v3736_v53  ;;  %v2927_v36 = vadd.f32 %v2926_v54, %v4747_v28 }
 0x435   :  { %v2928_v42 = vpop.f32.mrf.mxu1 }
 0x436   :  { %v3737_v32 = vpack.c.bf16 %v2927_v36, %v2925_v50  ;;  %v2929_v47 = vadd.f32 %v2928_v42, %v4745_v57 }
 0x437   :  { %v2930_v62 = vpop.f32.mrf.mxu1 }
 0x438   :  { %3403 = vst [vmem:[#allocation11 + $0x1c0] sm:$0xff] %v3737_v32  ;;  %v2931_v6 = vadd.f32 %v2930_v62, %v4747_v28 }
 0x439   :  { %v2934_v24 = vpop.f32.mrf.mxu1 }
 0x43a   :  { %v3738_v26 = vpack.c.bf16 %v2931_v6, %v2929_v47  ;;  %v2935_v52 = vadd.f32 %v2934_v24, %v4745_v57 }
 0x43b   :  { %v2936_v38 = vpop.f32.mrf.mxu1 }
 0x43c   :  { %3404 = vst [vmem:[#allocation11 + $0x1c8] sm:$0xff] %v3738_v26  ;;  %v2937_v17 = vadd.f32 %v2936_v38, %v4747_v28 }
 0x43d   :  { %v2938_v19 = vpop.f32.mrf.mxu1 }
 0x43e   :  { %v3739_v13 = vpack.c.bf16 %v2937_v17, %v2935_v52  ;;  %v2939_v29 = vadd.f32 %v2938_v19, %v4745_v57 }
 0x43f   :  { %v2940_v43 = vpop.f32.mrf.mxu1 }
 0x440   :  { %3405 = vst [vmem:[#allocation11 + $0x1d0] sm:$0xff] %v3739_v13  ;;  %v2941_v3 = vadd.f32 %v2940_v43, %v4747_v28 }
 0x441   :  { %v2944_v41 = vpop.f32.mrf.mxu1 }
 0x442   :  { %v3740_v14 = vpack.c.bf16 %v2941_v3, %v2939_v29  ;;  %v2945_v33 = vadd.f32 %v2944_v41, %v4745_v57 }
 0x443   :  { %v2946_v49 = vpop.f32.mrf.mxu1 }
 0x444   :  { %3406 = vst [vmem:[#allocation11 + $0x1d8] sm:$0xff] %v3740_v14  ;;  %v2947_v20 = vadd.f32 %v2946_v49, %v4747_v28 }
 0x445   :  { %v2948_v56 = vpop.f32.mrf.mxu1 }
 0x446   :  { %v3741_v31 = vpack.c.bf16 %v2947_v20, %v2945_v33  ;;  %v2949_v46 = vadd.f32 %v2948_v56, %v4745_v57 }
 0x447   :  { %v2950_v40 = vpop.f32.mrf.mxu1 }
 0x448   :  { %3407 = vst [vmem:[#allocation11 + $0x1e0] sm:$0xff] %v3741_v31  ;;  %v2951_v0 = vadd.f32 %v2950_v40, %v4747_v28 }
 0x449   :  { %v2954_v8 = vpop.f32.mrf.mxu1 }
 0x44a   :  { %v3742_v45 = vpack.c.bf16 %v2951_v0, %v2949_v46  ;;  %v2955_v11 = vadd.f32 %v2954_v8, %v4745_v57 }
 0x44b   :  { %v2956_v59 = vpop.f32.mrf.mxu1 }
 0x44c   :  { %3408 = vst [vmem:[#allocation11 + $0x1e8] sm:$0xff] %v3742_v45  ;;  %v2957_v37 = vadd.f32 %v2956_v59, %v4747_v28 }
 0x44d   :  { %v2958_v63 = vpop.f32.mrf.mxu1 }
 0x44e   :  { %v3743_v21 = vpack.c.bf16 %v2957_v37, %v2955_v11  ;;  %v2959_v25 = vadd.f32 %v2958_v63, %v4745_v57 }
 0x44f   :  { %v2960_v35 = vpop.f32.mrf.mxu1 }
 0x450   :  { %3409 = vst [vmem:[#allocation11 + $0x1f0] sm:$0xff] %v3743_v21  ;;  %v2961_v58 = vadd.f32 %v2960_v35, %v4747_v28 }
 0x452   :  { %v3744_v27 = vpack.c.bf16 %v2961_v58, %v2959_v25 }
 0x454   :  { %3410 = vst [vmem:[#allocation11 + $0x1f8] sm:$0xff] %v3744_v27 }
 0x455   :  { %4256 = shalt.err (!%p4253_p10)
}
 0x456   :  { %3422 = dma.vmem_to_hbm [thread:$0]  %s3417_s22, 8192, %s4910_s6, [#allocation5], %s4281_s17, %s4281_s17, %s4282_s18  }
 0x457   :  { %4271 = dma.done.wait [#allocation5], 8192  }
 0x458   :  { %4272 = vsyncadd [#allocation5], 4294959104 }
 0x459   :  { %3426 = vsyncpa [#allocation4], 1 }
 0x45a   :  { %3427 = vsyncpa [#allocation7], 1 }
 0x45b   :  { %3428 = vsyncpa [#allocation10], 1 }
 0x45c   :  { %3429 = vsyncpa [#allocation5], 1 }

</bundles_post_ra>
